<compile_context>
chip_gen: v7x
topology: tpu7x:2x2x1
jax: 0.10.0
libtpu: 0.0.40
codegen_flags: <defaults>
</compile_context>

<pallas_src>
import jax
import jax.numpy as jnp
from jax.experimental import pallas as pl
from jax.experimental.pallas import tpu as pltpu

INPUT_SIZE = 3
HIDDEN_SIZE = 25
OUTPUT_SIZE = 3   # single-layer LSTM (num_layers=1 in the reference module)

HP = 128          # hidden padded so each gate occupies exactly one 128-lane tile


def _sigmoid(x):
    # sigmoid(x) = 0.5 * (tanh(x/2) + 1): exactly one EUP op per gate.
    return 0.5 * jnp.tanh(0.5 * x) + 0.5


def lstm_fc_kernel(x_ref, wih_ref, whh_ref, b_ref, wfc_ref, bfc_ref, out_ref):
    """Single-layer LSTM recurrence + final FC in one gridless invocation.

    x_ref   : (B*S, I)    batch-major rows (row r = b*S + t), raw features
    wih_ref : (I, 4*HP)   input->gates weights (transposed, gate blocks of HP)
    whh_ref : (HP, 4*HP)  hidden->gates weights (transposed, gate blocks of HP)
    b_ref   : (1, 4*HP)   combined bias b_ih + b_hh (padded per gate block)
    wfc_ref : (HP, O)     fc weight (transposed; padded hidden rows are 0)
    bfc_ref : (1, O)      fc bias
    out_ref : (B, O)      prediction from the last timestep's hidden state
    """
    BS = x_ref.shape[0]
    Hp, _ = whh_ref.shape
    B, _ = out_ref.shape
    S = BS // B

    # Hoisted input projection for ALL timesteps (one MXU pass, true K = I,
    # bias folded in once) -- nothing but h @ W_hh remains on the serial chain.
    xw = (jnp.dot(x_ref[...], wih_ref[...], preferred_element_type=jnp.float32)
          + b_ref[...])                                            # (B*S, 4*HP)

    h = jnp.zeros((B, Hp), jnp.float32)
    c = jnp.zeros((B, Hp), jnp.float32)

    # Fully unrolled recurrence (S static & small); whh_ref is re-indexed per
    # step so it streams from VMEM instead of living in vregs across the loop.
    for t in range(S):
        # Gather this timestep's projected rows {b*S + t}: static 1-row
        # slices + a tiny sublane concat; independent of h (off the chain).
        x_t = jnp.concatenate(
            [xw[b * S + t:b * S + t + 1, :] for b in range(B)], axis=0)
        gates = x_t + jnp.dot(h, whh_ref[...],
                              preferred_element_type=jnp.float32)   # (B, 4*HP)
        # PyTorch gate order i, f, g, o -- each a full 128-lane block.
        i_g = _sigmoid(gates[:, 0 * Hp:1 * Hp])
        f_g = _sigmoid(gates[:, 1 * Hp:2 * Hp])
        g_g = jnp.tanh(gates[:, 2 * Hp:3 * Hp])
        o_g = _sigmoid(gates[:, 3 * Hp:4 * Hp])
        c = f_g * c + i_g * g_g
        h = o_g * jnp.tanh(c)
        # Padded gate lanes are exactly 0 -> tanh(0)=0 keeps padded c and h
        # at 0 for the whole recurrence.

    # Final FC: padded hidden lanes of h are 0 and padded rows of wfc are 0,
    # so the (B, O) result matches the unpadded math exactly.
    out_ref[...] = (jnp.dot(h, wfc_ref[...], preferred_element_type=jnp.float32)
                    + bfc_ref[...])


def prepare_params(params):
    """One-time weight prep: transpose + pad into the kernel's gate-block layout.

    Gate g (i, f, g, o) occupies columns [g*HP, g*HP + HIDDEN_SIZE); all padded
    entries are zero so the padded hidden state stays exactly zero.
    """
    w_ih, w_hh, b_ih, b_hh, w_fc, b_fc = params
    H, I, O = HIDDEN_SIZE, INPUT_SIZE, OUTPUT_SIZE

    wih_t = jnp.transpose(w_ih).astype(jnp.float32)       # (I, 4H)
    whh_t = jnp.transpose(w_hh).astype(jnp.float32)       # (H, 4H)
    b = (b_ih + b_hh).astype(jnp.float32)                 # (4H,)
    wfc_t = jnp.transpose(w_fc).astype(jnp.float32)       # (H, O)

    wih_pad = jnp.zeros((I, 4 * HP), jnp.float32)         # true K = I = 3
    whh_pad = jnp.zeros((HP, 4 * HP), jnp.float32)
    b_pad = jnp.zeros((1, 4 * HP), jnp.float32)
    for g in range(4):
        wih_pad = wih_pad.at[:, g * HP:g * HP + H].set(wih_t[:, g * H:(g + 1) * H])
        whh_pad = whh_pad.at[:H, g * HP:g * HP + H].set(whh_t[:, g * H:(g + 1) * H])
        b_pad = b_pad.at[0, g * HP:g * HP + H].set(b[g * H:(g + 1) * H])

    wfc_pad = jnp.zeros((HP, O), jnp.float32).at[:H, :].set(wfc_t)
    bfc_pad = b_fc.astype(jnp.float32).reshape(1, O)

    return (wih_pad, whh_pad, b_pad, wfc_pad, bfc_pad)


@jax.jit
def lstm_predictor(x, prepared_params):
    """x: (batch, seq, input_size) float32 -> (batch, output_size)."""
    wih_pad, whh_pad, b_pad, wfc_pad, bfc_pad = prepared_params
    B, S, I = x.shape

    # Only per-call host-side op: a free collapse-reshape (row r = b*S + t).
    x2d = x.reshape(B * S, I)

    vmem_spec = pl.BlockSpec(memory_space=pltpu.MemorySpace.VMEM)
    return pl.pallas_call(
        lstm_fc_kernel,
        out_shape=jax.ShapeDtypeStruct((B, OUTPUT_SIZE), jnp.float32),
        in_specs=[vmem_spec] * 6,
        out_specs=vmem_spec,
    )(x2d, wih_pad, whh_pad, b_pad, wfc_pad, bfc_pad)


def init_params(key):
    """Deterministic init matching PyTorch LSTM/Linear parameter shapes."""
    H, I, O = HIDDEN_SIZE, INPUT_SIZE, OUTPUT_SIZE
    ks = jax.random.split(key, 6)
    k_lstm = 1.0 / jnp.sqrt(H)
    k_fc = 1.0 / jnp.sqrt(H)
    w_ih = jax.random.uniform(ks[0], (4 * H, I), jnp.float32, -k_lstm, k_lstm)
    w_hh = jax.random.uniform(ks[1], (4 * H, H), jnp.float32, -k_lstm, k_lstm)
    b_ih = jax.random.uniform(ks[2], (4 * H,), jnp.float32, -k_lstm, k_lstm)
    b_hh = jax.random.uniform(ks[3], (4 * H,), jnp.float32, -k_lstm, k_lstm)
    w_fc = jax.random.uniform(ks[4], (O, H), jnp.float32, -k_fc, k_fc)
    b_fc = jax.random.uniform(ks[5], (O,), jnp.float32, -k_fc, k_fc)
    return (w_ih, w_hh, b_ih, b_hh, w_fc, b_fc)


def lstm_predictor_ref(x, params):
    """Pure-JAX reference replicating torch.nn.LSTM + Linear semantics."""
    w_ih, w_hh, b_ih, b_hh, w_fc, b_fc = params
    B, S, _ = x.shape
    H = HIDDEN_SIZE
    h = jnp.zeros((B, H), jnp.float32)
    c = jnp.zeros((B, H), jnp.float32)
    for t in range(S):
        g = x[:, t, :] @ w_ih.T + h @ w_hh.T + b_ih + b_hh
        i_g = jax.nn.sigmoid(g[:, 0:H])
        f_g = jax.nn.sigmoid(g[:, H:2 * H])
        g_g = jnp.tanh(g[:, 2 * H:3 * H])
        o_g = jax.nn.sigmoid(g[:, 3 * H:4 * H])
        c = f_g * c + i_g * g_g
        h = o_g * jnp.tanh(c)
    return h @ w_fc.T + b_fc


if __name__ == "__main__":
    key = jax.random.PRNGKey(0)
    k_x, k_p = jax.random.split(key)

    batch, seq = 2, 8
    x = jax.random.normal(k_x, (batch, seq, INPUT_SIZE), jnp.float32)
    params = init_params(k_p)

    prepared = prepare_params(params)            # one-time weight layout prep
    out = lstm_predictor(x, prepared)
    out = jax.block_until_ready(out)

    ref = lstm_predictor_ref(x, params)
    assert out.shape == (batch, OUTPUT_SIZE)
    # Tolerance 1e-4: kernel uses the tanh form of sigmoid and a padded-width
    # matmul, so f32 rounding differs from the reference at the ~1e-6 level.
    assert jnp.allclose(out, ref, atol=1e-4, rtol=1e-4)

    print("KERNEL_OK")
</pallas_src>

<mosaic_0001>
module attributes {stable_mosaic.version = 11 : i64} {
  func.func @lstm_fc_kernel(%arg0: memref<16x3xf32, #tpu.memory_space<vmem>>, %arg1: memref<3x512xf32, #tpu.memory_space<vmem>>, %arg2: memref<128x512xf32, #tpu.memory_space<vmem>>, %arg3: memref<1x512xf32, #tpu.memory_space<vmem>>, %arg4: memref<128x3xf32, #tpu.memory_space<vmem>>, %arg5: memref<1x3xf32, #tpu.memory_space<vmem>>, %arg6: memref<2x3xf32, #tpu.memory_space<vmem>>) attributes {dimension_semantics = [], scalar_prefetch = 0 : i64, scratch_operands = 0 : i64, tpu.core_type = #tpu.core_type<tc>} {
    %c0 = arith.constant 0 : index
    %c0_0 = arith.constant 0 : index
    %0 = vector.load %arg0[%c0, %c0_0] : memref<16x3xf32, #tpu.memory_space<vmem>>, vector<16x3xf32>
    %c0_1 = arith.constant 0 : index
    %c0_2 = arith.constant 0 : index
    %1 = vector.load %arg1[%c0_1, %c0_2] : memref<3x512xf32, #tpu.memory_space<vmem>>, vector<3x512xf32>
    %cst = arith.constant dense<0.000000e+00> : vector<16x512xf32>
    %2 = tpu.matmul %0, %1, %cst {dimension_numbers = #tpu.dot_dimension_numbers<[1], [0], [0], [1], [0, 0, 1, 1], [], []>} : vector<16x3xf32>, vector<3x512xf32>, vector<16x512xf32> -> vector<16x512xf32>
    %c0_3 = arith.constant 0 : index
    %c0_4 = arith.constant 0 : index
    %3 = vector.load %arg3[%c0_3, %c0_4] : memref<1x512xf32, #tpu.memory_space<vmem>>, vector<1x512xf32>
    %4 = vector.broadcast %3 : vector<1x512xf32> to vector<16x512xf32>
    %5 = arith.addf %2, %4 : vector<16x512xf32>
    %cst_5 = arith.constant 0.000000e+00 : f32
    %6 = vector.broadcast %cst_5 : f32 to vector<2x128xf32>
    %cst_6 = arith.constant 0.000000e+00 : f32
    %7 = vector.broadcast %cst_6 : f32 to vector<2x128xf32>
    %8 = vector.extract_strided_slice %5 {offsets = [0, 0], sizes = [1, 512], strides = [1, 1]} : vector<16x512xf32> to vector<1x512xf32>
    %9 = vector.extract_strided_slice %5 {offsets = [8, 0], sizes = [1, 512], strides = [1, 1]} : vector<16x512xf32> to vector<1x512xf32>
    %10 = tpu.concatenate %8, %9 in 0 : vector<1x512xf32>, vector<1x512xf32> -> vector<2x512xf32>
    %c0_7 = arith.constant 0 : index
    %c0_8 = arith.constant 0 : index
    %11 = vector.load %arg2[%c0_7, %c0_8] : memref<128x512xf32, #tpu.memory_space<vmem>>, vector<128x512xf32>
    %cst_9 = arith.constant dense<0.000000e+00> : vector<2x512xf32>
    %12 = tpu.matmul %6, %11, %cst_9 {dimension_numbers = #tpu.dot_dimension_numbers<[1], [0], [0], [1], [0, 0, 1, 1], [], []>} : vector<2x128xf32>, vector<128x512xf32>, vector<2x512xf32> -> vector<2x512xf32>
    %13 = arith.addf %10, %12 : vector<2x512xf32>
    %14 = vector.extract_strided_slice %13 {offsets = [0, 0], sizes = [2, 128], strides = [1, 1]} : vector<2x512xf32> to vector<2x128xf32>
    %cst_10 = arith.constant 5.000000e-01 : f32
    %15 = vector.broadcast %cst_10 : f32 to vector<2x128xf32>
    %16 = arith.mulf %15, %14 : vector<2x128xf32>
    %17 = math.tanh %16 : vector<2x128xf32>
    %cst_11 = arith.constant 5.000000e-01 : f32
    %18 = vector.broadcast %cst_11 : f32 to vector<2x128xf32>
    %19 = arith.mulf %18, %17 : vector<2x128xf32>
    %cst_12 = arith.constant 5.000000e-01 : f32
    %20 = vector.broadcast %cst_12 : f32 to vector<2x128xf32>
    %21 = arith.addf %19, %20 : vector<2x128xf32>
    %22 = vector.extract_strided_slice %13 {offsets = [0, 128], sizes = [2, 128], strides = [1, 1]} : vector<2x512xf32> to vector<2x128xf32>
    %cst_13 = arith.constant 5.000000e-01 : f32
    %23 = vector.broadcast %cst_13 : f32 to vector<2x128xf32>
    %24 = arith.mulf %23, %22 : vector<2x128xf32>
    %25 = math.tanh %24 : vector<2x128xf32>
    %cst_14 = arith.constant 5.000000e-01 : f32
    %26 = vector.broadcast %cst_14 : f32 to vector<2x128xf32>
    %27 = arith.mulf %26, %25 : vector<2x128xf32>
    %cst_15 = arith.constant 5.000000e-01 : f32
    %28 = vector.broadcast %cst_15 : f32 to vector<2x128xf32>
    %29 = arith.addf %27, %28 : vector<2x128xf32>
    %30 = vector.extract_strided_slice %13 {offsets = [0, 256], sizes = [2, 128], strides = [1, 1]} : vector<2x512xf32> to vector<2x128xf32>
    %31 = math.tanh %30 : vector<2x128xf32>
    %32 = vector.extract_strided_slice %13 {offsets = [0, 384], sizes = [2, 128], strides = [1, 1]} : vector<2x512xf32> to vector<2x128xf32>
    %cst_16 = arith.constant 5.000000e-01 : f32
    %33 = vector.broadcast %cst_16 : f32 to vector<2x128xf32>
    %34 = arith.mulf %33, %32 : vector<2x128xf32>
    %35 = math.tanh %34 : vector<2x128xf32>
    %cst_17 = arith.constant 5.000000e-01 : f32
    %36 = vector.broadcast %cst_17 : f32 to vector<2x128xf32>
    %37 = arith.mulf %36, %35 : vector<2x128xf32>
    %cst_18 = arith.constant 5.000000e-01 : f32
    %38 = vector.broadcast %cst_18 : f32 to vector<2x128xf32>
    %39 = arith.addf %37, %38 : vector<2x128xf32>
    %40 = arith.mulf %29, %7 : vector<2x128xf32>
    %41 = arith.mulf %21, %31 : vector<2x128xf32>
    %42 = arith.addf %40, %41 : vector<2x128xf32>
    %43 = math.tanh %42 : vector<2x128xf32>
    %44 = arith.mulf %39, %43 : vector<2x128xf32>
    %45 = vector.extract_strided_slice %5 {offsets = [1, 0], sizes = [1, 512], strides = [1, 1]} : vector<16x512xf32> to vector<1x512xf32>
    %46 = vector.extract_strided_slice %5 {offsets = [9, 0], sizes = [1, 512], strides = [1, 1]} : vector<16x512xf32> to vector<1x512xf32>
    %47 = tpu.concatenate %45, %46 in 0 : vector<1x512xf32>, vector<1x512xf32> -> vector<2x512xf32>
    %c0_19 = arith.constant 0 : index
    %c0_20 = arith.constant 0 : index
    %48 = vector.load %arg2[%c0_19, %c0_20] : memref<128x512xf32, #tpu.memory_space<vmem>>, vector<128x512xf32>
    %cst_21 = arith.constant dense<0.000000e+00> : vector<2x512xf32>
    %49 = tpu.matmul %44, %48, %cst_21 {dimension_numbers = #tpu.dot_dimension_numbers<[1], [0], [0], [1], [0, 0, 1, 1], [], []>} : vector<2x128xf32>, vector<128x512xf32>, vector<2x512xf32> -> vector<2x512xf32>
    %50 = arith.addf %47, %49 : vector<2x512xf32>
    %51 = vector.extract_strided_slice %50 {offsets = [0, 0], sizes = [2, 128], strides = [1, 1]} : vector<2x512xf32> to vector<2x128xf32>
    %cst_22 = arith.constant 5.000000e-01 : f32
    %52 = vector.broadcast %cst_22 : f32 to vector<2x128xf32>
    %53 = arith.mulf %52, %51 : vector<2x128xf32>
    %54 = math.tanh %53 : vector<2x128xf32>
    %cst_23 = arith.constant 5.000000e-01 : f32
    %55 = vector.broadcast %cst_23 : f32 to vector<2x128xf32>
    %56 = arith.mulf %55, %54 : vector<2x128xf32>
    %cst_24 = arith.constant 5.000000e-01 : f32
    %57 = vector.broadcast %cst_24 : f32 to vector<2x128xf32>
    %58 = arith.addf %56, %57 : vector<2x128xf32>
    %59 = vector.extract_strided_slice %50 {offsets = [0, 128], sizes = [2, 128], strides = [1, 1]} : vector<2x512xf32> to vector<2x128xf32>
    %cst_25 = arith.constant 5.000000e-01 : f32
    %60 = vector.broadcast %cst_25 : f32 to vector<2x128xf32>
    %61 = arith.mulf %60, %59 : vector<2x128xf32>
    %62 = math.tanh %61 : vector<2x128xf32>
    %cst_26 = arith.constant 5.000000e-01 : f32
    %63 = vector.broadcast %cst_26 : f32 to vector<2x128xf32>
    %64 = arith.mulf %63, %62 : vector<2x128xf32>
    %cst_27 = arith.constant 5.000000e-01 : f32
    %65 = vector.broadcast %cst_27 : f32 to vector<2x128xf32>
    %66 = arith.addf %64, %65 : vector<2x128xf32>
    %67 = vector.extract_strided_slice %50 {offsets = [0, 256], sizes = [2, 128], strides = [1, 1]} : vector<2x512xf32> to vector<2x128xf32>
    %68 = math.tanh %67 : vector<2x128xf32>
    %69 = vector.extract_strided_slice %50 {offsets = [0, 384], sizes = [2, 128], strides = [1, 1]} : vector<2x512xf32> to vector<2x128xf32>
    %cst_28 = arith.constant 5.000000e-01 : f32
    %70 = vector.broadcast %cst_28 : f32 to vector<2x128xf32>
    %71 = arith.mulf %70, %69 : vector<2x128xf32>
    %72 = math.tanh %71 : vector<2x128xf32>
    %cst_29 = arith.constant 5.000000e-01 : f32
    %73 = vector.broadcast %cst_29 : f32 to vector<2x128xf32>
    %74 = arith.mulf %73, %72 : vector<2x128xf32>
    %cst_30 = arith.constant 5.000000e-01 : f32
    %75 = vector.broadcast %cst_30 : f32 to vector<2x128xf32>
    %76 = arith.addf %74, %75 : vector<2x128xf32>
    %77 = arith.mulf %66, %42 : vector<2x128xf32>
    %78 = arith.mulf %58, %68 : vector<2x128xf32>
    %79 = arith.addf %77, %78 : vector<2x128xf32>
    %80 = math.tanh %79 : vector<2x128xf32>
    %81 = arith.mulf %76, %80 : vector<2x128xf32>
    %82 = vector.extract_strided_slice %5 {offsets = [2, 0], sizes = [1, 512], strides = [1, 1]} : vector<16x512xf32> to vector<1x512xf32>
    %83 = vector.extract_strided_slice %5 {offsets = [10, 0], sizes = [1, 512], strides = [1, 1]} : vector<16x512xf32> to vector<1x512xf32>
    %84 = tpu.concatenate %82, %83 in 0 : vector<1x512xf32>, vector<1x512xf32> -> vector<2x512xf32>
    %c0_31 = arith.constant 0 : index
    %c0_32 = arith.constant 0 : index
    %85 = vector.load %arg2[%c0_31, %c0_32] : memref<128x512xf32, #tpu.memory_space<vmem>>, vector<128x512xf32>
    %cst_33 = arith.constant dense<0.000000e+00> : vector<2x512xf32>
    %86 = tpu.matmul %81, %85, %cst_33 {dimension_numbers = #tpu.dot_dimension_numbers<[1], [0], [0], [1], [0, 0, 1, 1], [], []>} : vector<2x128xf32>, vector<128x512xf32>, vector<2x512xf32> -> vector<2x512xf32>
    %87 = arith.addf %84, %86 : vector<2x512xf32>
    %88 = vector.extract_strided_slice %87 {offsets = [0, 0], sizes = [2, 128], strides = [1, 1]} : vector<2x512xf32> to vector<2x128xf32>
    %cst_34 = arith.constant 5.000000e-01 : f32
    %89 = vector.broadcast %cst_34 : f32 to vector<2x128xf32>
    %90 = arith.mulf %89, %88 : vector<2x128xf32>
    %91 = math.tanh %90 : vector<2x128xf32>
    %cst_35 = arith.constant 5.000000e-01 : f32
    %92 = vector.broadcast %cst_35 : f32 to vector<2x128xf32>
    %93 = arith.mulf %92, %91 : vector<2x128xf32>
    %cst_36 = arith.constant 5.000000e-01 : f32
    %94 = vector.broadcast %cst_36 : f32 to vector<2x128xf32>
    %95 = arith.addf %93, %94 : vector<2x128xf32>
    %96 = vector.extract_strided_slice %87 {offsets = [0, 128], sizes = [2, 128], strides = [1, 1]} : vector<2x512xf32> to vector<2x128xf32>
    %cst_37 = arith.constant 5.000000e-01 : f32
    %97 = vector.broadcast %cst_37 : f32 to vector<2x128xf32>
    %98 = arith.mulf %97, %96 : vector<2x128xf32>
    %99 = math.tanh %98 : vector<2x128xf32>
    %cst_38 = arith.constant 5.000000e-01 : f32
    %100 = vector.broadcast %cst_38 : f32 to vector<2x128xf32>
    %101 = arith.mulf %100, %99 : vector<2x128xf32>
    %cst_39 = arith.constant 5.000000e-01 : f32
    %102 = vector.broadcast %cst_39 : f32 to vector<2x128xf32>
    %103 = arith.addf %101, %102 : vector<2x128xf32>
    %104 = vector.extract_strided_slice %87 {offsets = [0, 256], sizes = [2, 128], strides = [1, 1]} : vector<2x512xf32> to vector<2x128xf32>
    %105 = math.tanh %104 : vector<2x128xf32>
    %106 = vector.extract_strided_slice %87 {offsets = [0, 384], sizes = [2, 128], strides = [1, 1]} : vector<2x512xf32> to vector<2x128xf32>
    %cst_40 = arith.constant 5.000000e-01 : f32
    %107 = vector.broadcast %cst_40 : f32 to vector<2x128xf32>
    %108 = arith.mulf %107, %106 : vector<2x128xf32>
    %109 = math.tanh %108 : vector<2x128xf32>
    %cst_41 = arith.constant 5.000000e-01 : f32
    %110 = vector.broadcast %cst_41 : f32 to vector<2x128xf32>
    %111 = arith.mulf %110, %109 : vector<2x128xf32>
    %cst_42 = arith.constant 5.000000e-01 : f32
    %112 = vector.broadcast %cst_42 : f32 to vector<2x128xf32>
    %113 = arith.addf %111, %112 : vector<2x128xf32>
    %114 = arith.mulf %103, %79 : vector<2x128xf32>
    %115 = arith.mulf %95, %105 : vector<2x128xf32>
    %116 = arith.addf %114, %115 : vector<2x128xf32>
    %117 = math.tanh %116 : vector<2x128xf32>
    %118 = arith.mulf %113, %117 : vector<2x128xf32>
    %119 = vector.extract_strided_slice %5 {offsets = [3, 0], sizes = [1, 512], strides = [1, 1]} : vector<16x512xf32> to vector<1x512xf32>
    %120 = vector.extract_strided_slice %5 {offsets = [11, 0], sizes = [1, 512], strides = [1, 1]} : vector<16x512xf32> to vector<1x512xf32>
    %121 = tpu.concatenate %119, %120 in 0 : vector<1x512xf32>, vector<1x512xf32> -> vector<2x512xf32>
    %c0_43 = arith.constant 0 : index
    %c0_44 = arith.constant 0 : index
    %122 = vector.load %arg2[%c0_43, %c0_44] : memref<128x512xf32, #tpu.memory_space<vmem>>, vector<128x512xf32>
    %cst_45 = arith.constant dense<0.000000e+00> : vector<2x512xf32>
    %123 = tpu.matmul %118, %122, %cst_45 {dimension_numbers = #tpu.dot_dimension_numbers<[1], [0], [0], [1], [0, 0, 1, 1], [], []>} : vector<2x128xf32>, vector<128x512xf32>, vector<2x512xf32> -> vector<2x512xf32>
    %124 = arith.addf %121, %123 : vector<2x512xf32>
    %125 = vector.extract_strided_slice %124 {offsets = [0, 0], sizes = [2, 128], strides = [1, 1]} : vector<2x512xf32> to vector<2x128xf32>
    %cst_46 = arith.constant 5.000000e-01 : f32
    %126 = vector.broadcast %cst_46 : f32 to vector<2x128xf32>
    %127 = arith.mulf %126, %125 : vector<2x128xf32>
    %128 = math.tanh %127 : vector<2x128xf32>
    %cst_47 = arith.constant 5.000000e-01 : f32
    %129 = vector.broadcast %cst_47 : f32 to vector<2x128xf32>
    %130 = arith.mulf %129, %128 : vector<2x128xf32>
    %cst_48 = arith.constant 5.000000e-01 : f32
    %131 = vector.broadcast %cst_48 : f32 to vector<2x128xf32>
    %132 = arith.addf %130, %131 : vector<2x128xf32>
    %133 = vector.extract_strided_slice %124 {offsets = [0, 128], sizes = [2, 128], strides = [1, 1]} : vector<2x512xf32> to vector<2x128xf32>
    %cst_49 = arith.constant 5.000000e-01 : f32
    %134 = vector.broadcast %cst_49 : f32 to vector<2x128xf32>
    %135 = arith.mulf %134, %133 : vector<2x128xf32>
    %136 = math.tanh %135 : vector<2x128xf32>
    %cst_50 = arith.constant 5.000000e-01 : f32
    %137 = vector.broadcast %cst_50 : f32 to vector<2x128xf32>
    %138 = arith.mulf %137, %136 : vector<2x128xf32>
    %cst_51 = arith.constant 5.000000e-01 : f32
    %139 = vector.broadcast %cst_51 : f32 to vector<2x128xf32>
    %140 = arith.addf %138, %139 : vector<2x128xf32>
    %141 = vector.extract_strided_slice %124 {offsets = [0, 256], sizes = [2, 128], strides = [1, 1]} : vector<2x512xf32> to vector<2x128xf32>
    %142 = math.tanh %141 : vector<2x128xf32>
    %143 = vector.extract_strided_slice %124 {offsets = [0, 384], sizes = [2, 128], strides = [1, 1]} : vector<2x512xf32> to vector<2x128xf32>
    %cst_52 = arith.constant 5.000000e-01 : f32
    %144 = vector.broadcast %cst_52 : f32 to vector<2x128xf32>
    %145 = arith.mulf %144, %143 : vector<2x128xf32>
    %146 = math.tanh %145 : vector<2x128xf32>
    %cst_53 = arith.constant 5.000000e-01 : f32
    %147 = vector.broadcast %cst_53 : f32 to vector<2x128xf32>
    %148 = arith.mulf %147, %146 : vector<2x128xf32>
    %cst_54 = arith.constant 5.000000e-01 : f32
    %149 = vector.broadcast %cst_54 : f32 to vector<2x128xf32>
    %150 = arith.addf %148, %149 : vector<2x128xf32>
    %151 = arith.mulf %140, %116 : vector<2x128xf32>
    %152 = arith.mulf %132, %142 : vector<2x128xf32>
    %153 = arith.addf %151, %152 : vector<2x128xf32>
    %154 = math.tanh %153 : vector<2x128xf32>
    %155 = arith.mulf %150, %154 : vector<2x128xf32>
    %156 = vector.extract_strided_slice %5 {offsets = [4, 0], sizes = [1, 512], strides = [1, 1]} : vector<16x512xf32> to vector<1x512xf32>
    %157 = vector.extract_strided_slice %5 {offsets = [12, 0], sizes = [1, 512], strides = [1, 1]} : vector<16x512xf32> to vector<1x512xf32>
    %158 = tpu.concatenate %156, %157 in 0 : vector<1x512xf32>, vector<1x512xf32> -> vector<2x512xf32>
    %c0_55 = arith.constant 0 : index
    %c0_56 = arith.constant 0 : index
    %159 = vector.load %arg2[%c0_55, %c0_56] : memref<128x512xf32, #tpu.memory_space<vmem>>, vector<128x512xf32>
    %cst_57 = arith.constant dense<0.000000e+00> : vector<2x512xf32>
    %160 = tpu.matmul %155, %159, %cst_57 {dimension_numbers = #tpu.dot_dimension_numbers<[1], [0], [0], [1], [0, 0, 1, 1], [], []>} : vector<2x128xf32>, vector<128x512xf32>, vector<2x512xf32> -> vector<2x512xf32>
    %161 = arith.addf %158, %160 : vector<2x512xf32>
    %162 = vector.extract_strided_slice %161 {offsets = [0, 0], sizes = [2, 128], strides = [1, 1]} : vector<2x512xf32> to vector<2x128xf32>
    %cst_58 = arith.constant 5.000000e-01 : f32
    %163 = vector.broadcast %cst_58 : f32 to vector<2x128xf32>
    %164 = arith.mulf %163, %162 : vector<2x128xf32>
    %165 = math.tanh %164 : vector<2x128xf32>
    %cst_59 = arith.constant 5.000000e-01 : f32
    %166 = vector.broadcast %cst_59 : f32 to vector<2x128xf32>
    %167 = arith.mulf %166, %165 : vector<2x128xf32>
    %cst_60 = arith.constant 5.000000e-01 : f32
    %168 = vector.broadcast %cst_60 : f32 to vector<2x128xf32>
    %169 = arith.addf %167, %168 : vector<2x128xf32>
    %170 = vector.extract_strided_slice %161 {offsets = [0, 128], sizes = [2, 128], strides = [1, 1]} : vector<2x512xf32> to vector<2x128xf32>
    %cst_61 = arith.constant 5.000000e-01 : f32
    %171 = vector.broadcast %cst_61 : f32 to vector<2x128xf32>
    %172 = arith.mulf %171, %170 : vector<2x128xf32>
    %173 = math.tanh %172 : vector<2x128xf32>
    %cst_62 = arith.constant 5.000000e-01 : f32
    %174 = vector.broadcast %cst_62 : f32 to vector<2x128xf32>
    %175 = arith.mulf %174, %173 : vector<2x128xf32>
    %cst_63 = arith.constant 5.000000e-01 : f32
    %176 = vector.broadcast %cst_63 : f32 to vector<2x128xf32>
    %177 = arith.addf %175, %176 : vector<2x128xf32>
    %178 = vector.extract_strided_slice %161 {offsets = [0, 256], sizes = [2, 128], strides = [1, 1]} : vector<2x512xf32> to vector<2x128xf32>
    %179 = math.tanh %178 : vector<2x128xf32>
    %180 = vector.extract_strided_slice %161 {offsets = [0, 384], sizes = [2, 128], strides = [1, 1]} : vector<2x512xf32> to vector<2x128xf32>
    %cst_64 = arith.constant 5.000000e-01 : f32
    %181 = vector.broadcast %cst_64 : f32 to vector<2x128xf32>
    %182 = arith.mulf %181, %180 : vector<2x128xf32>
    %183 = math.tanh %182 : vector<2x128xf32>
    %cst_65 = arith.constant 5.000000e-01 : f32
    %184 = vector.broadcast %cst_65 : f32 to vector<2x128xf32>
    %185 = arith.mulf %184, %183 : vector<2x128xf32>
    %cst_66 = arith.constant 5.000000e-01 : f32
    %186 = vector.broadcast %cst_66 : f32 to vector<2x128xf32>
    %187 = arith.addf %185, %186 : vector<2x128xf32>
    %188 = arith.mulf %177, %153 : vector<2x128xf32>
    %189 = arith.mulf %169, %179 : vector<2x128xf32>
    %190 = arith.addf %188, %189 : vector<2x128xf32>
    %191 = math.tanh %190 : vector<2x128xf32>
    %192 = arith.mulf %187, %191 : vector<2x128xf32>
    %193 = vector.extract_strided_slice %5 {offsets = [5, 0], sizes = [1, 512], strides = [1, 1]} : vector<16x512xf32> to vector<1x512xf32>
    %194 = vector.extract_strided_slice %5 {offsets = [13, 0], sizes = [1, 512], strides = [1, 1]} : vector<16x512xf32> to vector<1x512xf32>
    %195 = tpu.concatenate %193, %194 in 0 : vector<1x512xf32>, vector<1x512xf32> -> vector<2x512xf32>
    %c0_67 = arith.constant 0 : index
    %c0_68 = arith.constant 0 : index
    %196 = vector.load %arg2[%c0_67, %c0_68] : memref<128x512xf32, #tpu.memory_space<vmem>>, vector<128x512xf32>
    %cst_69 = arith.constant dense<0.000000e+00> : vector<2x512xf32>
    %197 = tpu.matmul %192, %196, %cst_69 {dimension_numbers = #tpu.dot_dimension_numbers<[1], [0], [0], [1], [0, 0, 1, 1], [], []>} : vector<2x128xf32>, vector<128x512xf32>, vector<2x512xf32> -> vector<2x512xf32>
    %198 = arith.addf %195, %197 : vector<2x512xf32>
    %199 = vector.extract_strided_slice %198 {offsets = [0, 0], sizes = [2, 128], strides = [1, 1]} : vector<2x512xf32> to vector<2x128xf32>
    %cst_70 = arith.constant 5.000000e-01 : f32
    %200 = vector.broadcast %cst_70 : f32 to vector<2x128xf32>
    %201 = arith.mulf %200, %199 : vector<2x128xf32>
    %202 = math.tanh %201 : vector<2x128xf32>
    %cst_71 = arith.constant 5.000000e-01 : f32
    %203 = vector.broadcast %cst_71 : f32 to vector<2x128xf32>
    %204 = arith.mulf %203, %202 : vector<2x128xf32>
    %cst_72 = arith.constant 5.000000e-01 : f32
    %205 = vector.broadcast %cst_72 : f32 to vector<2x128xf32>
    %206 = arith.addf %204, %205 : vector<2x128xf32>
    %207 = vector.extract_strided_slice %198 {offsets = [0, 128], sizes = [2, 128], strides = [1, 1]} : vector<2x512xf32> to vector<2x128xf32>
    %cst_73 = arith.constant 5.000000e-01 : f32
    %208 = vector.broadcast %cst_73 : f32 to vector<2x128xf32>
    %209 = arith.mulf %208, %207 : vector<2x128xf32>
    %210 = math.tanh %209 : vector<2x128xf32>
    %cst_74 = arith.constant 5.000000e-01 : f32
    %211 = vector.broadcast %cst_74 : f32 to vector<2x128xf32>
    %212 = arith.mulf %211, %210 : vector<2x128xf32>
    %cst_75 = arith.constant 5.000000e-01 : f32
    %213 = vector.broadcast %cst_75 : f32 to vector<2x128xf32>
    %214 = arith.addf %212, %213 : vector<2x128xf32>
    %215 = vector.extract_strided_slice %198 {offsets = [0, 256], sizes = [2, 128], strides = [1, 1]} : vector<2x512xf32> to vector<2x128xf32>
    %216 = math.tanh %215 : vector<2x128xf32>
    %217 = vector.extract_strided_slice %198 {offsets = [0, 384], sizes = [2, 128], strides = [1, 1]} : vector<2x512xf32> to vector<2x128xf32>
    %cst_76 = arith.constant 5.000000e-01 : f32
    %218 = vector.broadcast %cst_76 : f32 to vector<2x128xf32>
    %219 = arith.mulf %218, %217 : vector<2x128xf32>
    %220 = math.tanh %219 : vector<2x128xf32>
    %cst_77 = arith.constant 5.000000e-01 : f32
    %221 = vector.broadcast %cst_77 : f32 to vector<2x128xf32>
    %222 = arith.mulf %221, %220 : vector<2x128xf32>
    %cst_78 = arith.constant 5.000000e-01 : f32
    %223 = vector.broadcast %cst_78 : f32 to vector<2x128xf32>
    %224 = arith.addf %222, %223 : vector<2x128xf32>
    %225 = arith.mulf %214, %190 : vector<2x128xf32>
    %226 = arith.mulf %206, %216 : vector<2x128xf32>
    %227 = arith.addf %225, %226 : vector<2x128xf32>
    %228 = math.tanh %227 : vector<2x128xf32>
    %229 = arith.mulf %224, %228 : vector<2x128xf32>
    %230 = vector.extract_strided_slice %5 {offsets = [6, 0], sizes = [1, 512], strides = [1, 1]} : vector<16x512xf32> to vector<1x512xf32>
    %231 = vector.extract_strided_slice %5 {offsets = [14, 0], sizes = [1, 512], strides = [1, 1]} : vector<16x512xf32> to vector<1x512xf32>
    %232 = tpu.concatenate %230, %231 in 0 : vector<1x512xf32>, vector<1x512xf32> -> vector<2x512xf32>
    %c0_79 = arith.constant 0 : index
    %c0_80 = arith.constant 0 : index
    %233 = vector.load %arg2[%c0_79, %c0_80] : memref<128x512xf32, #tpu.memory_space<vmem>>, vector<128x512xf32>
    %cst_81 = arith.constant dense<0.000000e+00> : vector<2x512xf32>
    %234 = tpu.matmul %229, %233, %cst_81 {dimension_numbers = #tpu.dot_dimension_numbers<[1], [0], [0], [1], [0, 0, 1, 1], [], []>} : vector<2x128xf32>, vector<128x512xf32>, vector<2x512xf32> -> vector<2x512xf32>
    %235 = arith.addf %232, %234 : vector<2x512xf32>
    %236 = vector.extract_strided_slice %235 {offsets = [0, 0], sizes = [2, 128], strides = [1, 1]} : vector<2x512xf32> to vector<2x128xf32>
    %cst_82 = arith.constant 5.000000e-01 : f32
    %237 = vector.broadcast %cst_82 : f32 to vector<2x128xf32>
    %238 = arith.mulf %237, %236 : vector<2x128xf32>
    %239 = math.tanh %238 : vector<2x128xf32>
    %cst_83 = arith.constant 5.000000e-01 : f32
    %240 = vector.broadcast %cst_83 : f32 to vector<2x128xf32>
    %241 = arith.mulf %240, %239 : vector<2x128xf32>
    %cst_84 = arith.constant 5.000000e-01 : f32
    %242 = vector.broadcast %cst_84 : f32 to vector<2x128xf32>
    %243 = arith.addf %241, %242 : vector<2x128xf32>
    %244 = vector.extract_strided_slice %235 {offsets = [0, 128], sizes = [2, 128], strides = [1, 1]} : vector<2x512xf32> to vector<2x128xf32>
    %cst_85 = arith.constant 5.000000e-01 : f32
    %245 = vector.broadcast %cst_85 : f32 to vector<2x128xf32>
    %246 = arith.mulf %245, %244 : vector<2x128xf32>
    %247 = math.tanh %246 : vector<2x128xf32>
    %cst_86 = arith.constant 5.000000e-01 : f32
    %248 = vector.broadcast %cst_86 : f32 to vector<2x128xf32>
    %249 = arith.mulf %248, %247 : vector<2x128xf32>
    %cst_87 = arith.constant 5.000000e-01 : f32
    %250 = vector.broadcast %cst_87 : f32 to vector<2x128xf32>
    %251 = arith.addf %249, %250 : vector<2x128xf32>
    %252 = vector.extract_strided_slice %235 {offsets = [0, 256], sizes = [2, 128], strides = [1, 1]} : vector<2x512xf32> to vector<2x128xf32>
    %253 = math.tanh %252 : vector<2x128xf32>
    %254 = vector.extract_strided_slice %235 {offsets = [0, 384], sizes = [2, 128], strides = [1, 1]} : vector<2x512xf32> to vector<2x128xf32>
    %cst_88 = arith.constant 5.000000e-01 : f32
    %255 = vector.broadcast %cst_88 : f32 to vector<2x128xf32>
    %256 = arith.mulf %255, %254 : vector<2x128xf32>
    %257 = math.tanh %256 : vector<2x128xf32>
    %cst_89 = arith.constant 5.000000e-01 : f32
    %258 = vector.broadcast %cst_89 : f32 to vector<2x128xf32>
    %259 = arith.mulf %258, %257 : vector<2x128xf32>
    %cst_90 = arith.constant 5.000000e-01 : f32
    %260 = vector.broadcast %cst_90 : f32 to vector<2x128xf32>
    %261 = arith.addf %259, %260 : vector<2x128xf32>
    %262 = arith.mulf %251, %227 : vector<2x128xf32>
    %263 = arith.mulf %243, %253 : vector<2x128xf32>
    %264 = arith.addf %262, %263 : vector<2x128xf32>
    %265 = math.tanh %264 : vector<2x128xf32>
    %266 = arith.mulf %261, %265 : vector<2x128xf32>
    %267 = vector.extract_strided_slice %5 {offsets = [7, 0], sizes = [1, 512], strides = [1, 1]} : vector<16x512xf32> to vector<1x512xf32>
    %268 = vector.extract_strided_slice %5 {offsets = [15, 0], sizes = [1, 512], strides = [1, 1]} : vector<16x512xf32> to vector<1x512xf32>
    %269 = tpu.concatenate %267, %268 in 0 : vector<1x512xf32>, vector<1x512xf32> -> vector<2x512xf32>
    %c0_91 = arith.constant 0 : index
    %c0_92 = arith.constant 0 : index
    %270 = vector.load %arg2[%c0_91, %c0_92] : memref<128x512xf32, #tpu.memory_space<vmem>>, vector<128x512xf32>
    %cst_93 = arith.constant dense<0.000000e+00> : vector<2x512xf32>
    %271 = tpu.matmul %266, %270, %cst_93 {dimension_numbers = #tpu.dot_dimension_numbers<[1], [0], [0], [1], [0, 0, 1, 1], [], []>} : vector<2x128xf32>, vector<128x512xf32>, vector<2x512xf32> -> vector<2x512xf32>
    %272 = arith.addf %269, %271 : vector<2x512xf32>
    %273 = vector.extract_strided_slice %272 {offsets = [0, 0], sizes = [2, 128], strides = [1, 1]} : vector<2x512xf32> to vector<2x128xf32>
    %cst_94 = arith.constant 5.000000e-01 : f32
    %274 = vector.broadcast %cst_94 : f32 to vector<2x128xf32>
    %275 = arith.mulf %274, %273 : vector<2x128xf32>
    %276 = math.tanh %275 : vector<2x128xf32>
    %cst_95 = arith.constant 5.000000e-01 : f32
    %277 = vector.broadcast %cst_95 : f32 to vector<2x128xf32>
    %278 = arith.mulf %277, %276 : vector<2x128xf32>
    %cst_96 = arith.constant 5.000000e-01 : f32
    %279 = vector.broadcast %cst_96 : f32 to vector<2x128xf32>
    %280 = arith.addf %278, %279 : vector<2x128xf32>
    %281 = vector.extract_strided_slice %272 {offsets = [0, 128], sizes = [2, 128], strides = [1, 1]} : vector<2x512xf32> to vector<2x128xf32>
    %cst_97 = arith.constant 5.000000e-01 : f32
    %282 = vector.broadcast %cst_97 : f32 to vector<2x128xf32>
    %283 = arith.mulf %282, %281 : vector<2x128xf32>
    %284 = math.tanh %283 : vector<2x128xf32>
    %cst_98 = arith.constant 5.000000e-01 : f32
    %285 = vector.broadcast %cst_98 : f32 to vector<2x128xf32>
    %286 = arith.mulf %285, %284 : vector<2x128xf32>
    %cst_99 = arith.constant 5.000000e-01 : f32
    %287 = vector.broadcast %cst_99 : f32 to vector<2x128xf32>
    %288 = arith.addf %286, %287 : vector<2x128xf32>
    %289 = vector.extract_strided_slice %272 {offsets = [0, 256], sizes = [2, 128], strides = [1, 1]} : vector<2x512xf32> to vector<2x128xf32>
    %290 = math.tanh %289 : vector<2x128xf32>
    %291 = vector.extract_strided_slice %272 {offsets = [0, 384], sizes = [2, 128], strides = [1, 1]} : vector<2x512xf32> to vector<2x128xf32>
    %cst_100 = arith.constant 5.000000e-01 : f32
    %292 = vector.broadcast %cst_100 : f32 to vector<2x128xf32>
    %293 = arith.mulf %292, %291 : vector<2x128xf32>
    %294 = math.tanh %293 : vector<2x128xf32>
    %cst_101 = arith.constant 5.000000e-01 : f32
    %295 = vector.broadcast %cst_101 : f32 to vector<2x128xf32>
    %296 = arith.mulf %295, %294 : vector<2x128xf32>
    %cst_102 = arith.constant 5.000000e-01 : f32
    %297 = vector.broadcast %cst_102 : f32 to vector<2x128xf32>
    %298 = arith.addf %296, %297 : vector<2x128xf32>
    %299 = arith.mulf %288, %264 : vector<2x128xf32>
    %300 = arith.mulf %280, %290 : vector<2x128xf32>
    %301 = arith.addf %299, %300 : vector<2x128xf32>
    %302 = math.tanh %301 : vector<2x128xf32>
    %303 = arith.mulf %298, %302 : vector<2x128xf32>
    %c0_103 = arith.constant 0 : index
    %c0_104 = arith.constant 0 : index
    %304 = vector.load %arg4[%c0_103, %c0_104] : memref<128x3xf32, #tpu.memory_space<vmem>>, vector<128x3xf32>
    %cst_105 = arith.constant dense<0.000000e+00> : vector<2x3xf32>
    %305 = tpu.matmul %303, %304, %cst_105 {dimension_numbers = #tpu.dot_dimension_numbers<[1], [0], [0], [1], [0, 0, 1, 1], [], []>} : vector<2x128xf32>, vector<128x3xf32>, vector<2x3xf32> -> vector<2x3xf32>
    %c0_106 = arith.constant 0 : index
    %c0_107 = arith.constant 0 : index
    %306 = vector.load %arg5[%c0_106, %c0_107] : memref<1x3xf32, #tpu.memory_space<vmem>>, vector<1x3xf32>
    %307 = vector.broadcast %306 : vector<1x3xf32> to vector<2x3xf32>
    %308 = arith.addf %305, %307 : vector<2x3xf32>
    %c0_108 = arith.constant 0 : index
    %c0_109 = arith.constant 0 : index
    %309 = vector.load %arg6[%c0_108, %c0_109] : memref<2x3xf32, #tpu.memory_space<vmem>>, vector<2x3xf32>
    tpu.vector_store %arg6[%c0_108, %c0_109], %308 {strides = array<i32>} : memref<2x3xf32, #tpu.memory_space<vmem>>, vector<2x3xf32>,
    return
  }
}

</mosaic_0001>

<bundles_post_ra>
// kernel: lstm_predictor.1
= control target key start
LH: loop header
LB: loop body
LE: loop exit
PB: predicated region body
PF: predicated region fallthrough
CT: control target
= control target key end

     0   :  { %11 = vsyncpa [#allocation3], 0  ;;  %s3310_s0 = inlined_call_operand.vmem [shape: f32[16,3], index: 0, kind: input, shape index: {}]   ;;  %s3311_s1 = inlined_call_operand.vmem [shape: f32[3,512], index: 1, kind: input, shape index: {}]   ;;  %s3312_s2 = inlined_call_operand.hbm [shape: f32[128,512], index: 2, kind: input, shape index: {}]   ;;  %s3313_s3 = inlined_call_operand.vmem [shape: f32[1,512], index: 3, kind: input, shape index: {}]   ;;  %s3314_s4 = inlined_call_operand.vmem [shape: f32[128,3], index: 4, kind: input, shape index: {}]   ;;  %s3315_s5 = inlined_call_operand.vmem [shape: f32[1,3], index: 5, kind: input, shape index: {}]   ;;  %s3316_s6 = inlined_call_operand.hbm [shape: f32[2,3], index: 6, kind: output, shape index: {}]  }
   0x1   :  { %12 = vsyncpa [#allocation4], 0  ;;  %s2611_s21 = smov [#allocation2]   ;;  %s2563_s25 = scalar_lea.hbm %s3312_s2, 8192 }
   0x2   :  { %s22_s22 = sshll.u32 %s2611_s21, 4  ;;  %p2564_p0 = scmp.ne.s32.totalorder %s3312_s2, %s2563_s25  ;;  %s23_s22 = int_to_ptr.vmem [resolvable:$true] %s22_s22 }
   0x3   :  { %p2567_p1 = scmp.lt.u32.totalorder %s2563_s25, %s3312_s2 }
   0x5   :  { %p2569_p2 = pnand %p2567_p1, %p2564_p0 }
   0x7   :  { %2572 = shalt.err (!%p2569_p2)
}
   0x8   :  { %s2573_s30 = scalar_lea.vmem %s23_s22, 8192  ;;  %p2578_p4 = scmp.lt.s32.totalorder %s23_s22, %s23_s22 }
   0x9   :  { %p2574_p3 = scmp.ne.s32.totalorder %s23_s22, %s2573_s30  ;;  %p2579_p5 = scmp.lt.s32.totalorder %s2573_s30, %s2573_s30 }
   0xb   :  { %p2580_p6 = por %p2579_p5, %p2578_p4 }
   0xd   :  { %p2581_p7 = pnand %p2580_p6, %p2574_p3 }
   0xf   :  { %2584 = shalt.err (!%p2581_p7)
}
  0x10   :  { %s2612_s7 = smov 512   ;;  %s2613_s8 = smov 32  }
  0x11   :  { %28 = dma.hbm_to_vmem [thread:$0]  %s3312_s2, 8192, %s23_s22, [#allocation3], %s2612_s7, %s2612_s7, %s2613_s8  }
  0x12   :  { %2607 = dma.done.wait [#allocation3], 8192  }
  0x13   :  { %2608 = vsyncadd [#allocation3], 4294959104  ;;  %v3317_v0 = vmov 0.0   ;;  %v40_v1 = vld [vmem:[%s3311_s1] sm:$0x77]  ;;  %vm75_vm0 = vcmask 1042432  }
  0x14   :  { %148 = vmatprep.mubr.f32.mxu1 %v3317_v0  ;;  %383 = vmatprep.mubr.f32.mxu0 %v3317_v0  ;;  %v256_v2 = vld [vmem:[#allocation2 + $0x8] sm:$0xff]  ;;  %v66_v4 = vcombine.high %v40_v1, %v40_v1  ;;  %v255_v6 = vld [vmem:[#allocation2] sm:$0xff]  ;;  %v38_v8 = vld [vmem:[%s3310_s0] sm:$0xff]  ;;  %vm68_vm1 = vcmask 23552   ;;  %vm250_vm2 = vcmask 1040384   ;;  %vm2616_vm3 = vmmov 0  }
  0x15   :  { %v260_v3 = vld [vmem:[#allocation2 + $0x28] sm:$0xff]  ;;  %v259_v7 = vld [vmem:[#allocation2 + $0x20] sm:$0xff]  ;;  %v41_v10 = vld [vmem:[%s3311_s1 + $0x8] sm:$0x77]  ;;  %s2617_s22 = smov [#allocation5]   ;;  %vm1860_vm4 = vcmask 17408  }
  0x16   :  { %v2670_v5 = vpack.c.bf16 %v260_v3, %v256_v2  ;;  %v2675_v9 = vpack.c.bf16 %v259_v7, %v255_v6  ;;  %v264_v11 = vld [vmem:[#allocation2 + $0x48] sm:$0xff]  ;;  %1877 = vmatprep.subr.msk.mxu1 %vm75_vm0, %v66_v4  ;;  %v67_v13 = vcombine.high %v41_v10, %v41_v10  ;;  %v263_v15 = vld [vmem:[#allocation2 + $0x40] sm:$0xff]  ;;  %v258_v23 = vld [vmem:[#allocation2 + $0x18] sm:$0xff]  ;;  %s1868_s23 = sshll.u32 %s2617_s22, 4  ;;  %s1869_s23 = int_to_ptr.vmem [resolvable:$true] %s1868_s23 }
  0x17   :  { %v268_v12 = vld [vmem:[#allocation2 + $0x68] sm:$0xff]  ;;  %v267_v16 = vld [vmem:[#allocation2 + $0x60] sm:$0xff]  ;;  %1878 = vmatpush1.msk.msra.mxu1 %vm75_vm0, %v40_v1  ;;  %v262_v24 = vld [vmem:[#allocation2 + $0x38] sm:$0xff]  ;;  %s2585_s24 = scalar_lea.vmem %s1869_s23, 32  ;;  %p2590_p9 = scmp.lt.s32.totalorder %s1869_s23, %s1869_s23 }
  0x18   :  { %3329 = vst [vmem:[#allocation8_spill] sm:$0xff] %v2670_v5  ;;  %1939 = vmatprep.subr.bf16.mxu0 %v2670_v5  ;;  %v2682_v14 = vpack.c.bf16 %v268_v12, %v264_v11  ;;  %v2686_v17 = vpack.c.bf16 %v267_v16, %v263_v15  ;;  %v272_v18 = vld [vmem:[#allocation2 + $0x88] sm:$0xff]  ;;  %v271_v20 = vld [vmem:[#allocation2 + $0x80] sm:$0xff]  ;;  %1879 = vmatmul.mubr.msk.f32.vlgmr.msra.gmra.mrb[0].mxu1 %vm68_vm1, %v38_v8  ;;  %v39_v25 = vld [vmem:[%s3310_s0 + $0x8] sm:$0xff]  ;;  %p2586_p8 = scmp.ne.s32.totalorder %s1869_s23, %s2585_s24  ;;  %p2591_p10 = scmp.lt.s32.totalorder %s2585_s24, %s2585_s24 }
  0x19   :  { %1941 = vmatpush1.bf16.msra.mxu0 %v2675_v9  ;;  %v276_v19 = vld [vmem:[#allocation2 + $0xa8] sm:$0xff]  ;;  %1881 = vmatprep.subr.msk.mxu1 %vm75_vm0, %v67_v13  ;;  %v275_v22 = vld [vmem:[#allocation2 + $0xa0] sm:$0xff]  ;;  %v2697_v26 = vpack.c.bf16 %v262_v24, %v258_v23  ;;  %v257_v28 = vld [vmem:[#allocation2 + $0x10] sm:$0xff] }
  0x1a   :  { %v2690_v21 = vpack.c.bf16 %v276_v19, %v272_v18  ;;  %1882 = vmatpush1.msk.msra.mxu1 %vm75_vm0, %v41_v10  ;;  %1943 = vmatprep.subr.bf16.mxu0 %v2682_v14  ;;  %v280_v27 = vld [vmem:[#allocation2 + $0xc8] sm:$0xff]  ;;  %v261_v29 = vld [vmem:[#allocation2 + $0x30] sm:$0xff]  ;;  %v2701_v31 = vpack.c.bf16 %v275_v22, %v271_v20  ;;  %v266_v32 = vld [vmem:[#allocation2 + $0x58] sm:$0xff]  ;;  %p2592_p11 = por %p2591_p10, %p2590_p9 }
  0x1b   :  { %3330 = vst [vmem:[#allocation9_spill] sm:$0xff] %v2697_v26  ;;  %154 = vmatprep.mubr.f32.mxu1 %v3317_v0  ;;  %v284_v30 = vld [vmem:[#allocation2 + $0xe8] sm:$0xff]  ;;  %1971 = vmatprep.subr.bf16.mxu1 %v2697_v26  ;;  %v270_v33 = vld [vmem:[#allocation2 + $0x78] sm:$0xff]  ;;  %v279_v35 = vld [vmem:[#allocation2 + $0xc0] sm:$0xff]  ;;  %v2709_v37 = vpack.c.bf16 %v261_v29, %v257_v28 }
  0x1c   :  { %1880 = vmatmul.mubr.msk.f32.gmra.mrb[2].mxu1 %vm68_vm1, %v39_v25  ;;  %v2706_v34 = vpack.c.bf16 %v284_v30, %v280_v27  ;;  %v283_v36 = vld [vmem:[#allocation2 + $0xe0] sm:$0xff]  ;;  %v288_v38 = vld [vmem:[#allocation2 + $0x108] sm:$0xff]  ;;  %v2711_v40 = vpack.c.bf16 %v270_v33, %v266_v32  ;;  %v265_v41 = vld [vmem:[#allocation2 + $0x50] sm:$0xff]  ;;  %p2593_p12 = pnand %p2592_p11, %p2586_p8 }
  0x1d   :  { %1945 = vmatpush1.bf16.msra.mxu0 %v2686_v17  ;;  %225 = vmatprep.mubr.f32.mxu1 %v3317_v0  ;;  %v292_v39 = vld [vmem:[#allocation2 + $0x128] sm:$0xff]  ;;  %v269_v42 = vld [vmem:[#allocation2 + $0x70] sm:$0xff]  ;;  %v2714_v43 = vpack.c.bf16 %v283_v36, %v279_v35  ;;  %v274_v44 = vld [vmem:[#allocation2 + $0x98] sm:$0xff] }
  0x1e   :  { %1947 = vmatprep.subr.bf16.mxu0 %v2690_v21  ;;  %v278_v45 = vld [vmem:[#allocation2 + $0xb8] sm:$0xff]  ;;  %v2718_v46 = vpack.c.bf16 %v292_v39, %v288_v38  ;;  %v287_v47 = vld [vmem:[#allocation2 + $0x100] sm:$0xff]  ;;  %v2722_v49 = vpack.c.bf16 %v269_v42, %v265_v41  ;;  %v296_v50 = vld [vmem:[#allocation2 + $0x148] sm:$0xff] }
  0x1f   :  { %v291_v48 = vld [vmem:[#allocation2 + $0x120] sm:$0xff]  ;;  %v300_v51 = vld [vmem:[#allocation2 + $0x168] sm:$0xff]  ;;  %v2725_v52 = vpack.c.bf16 %v278_v45, %v274_v44  ;;  %v273_v53 = vld [vmem:[#allocation2 + $0x90] sm:$0xff] }
  0x20   :  { %1883 = vmatmul.mubr.msk.f32.vlgmr.msra.gmra.mrb[4].mxu1 %vm68_vm1, %v38_v8  ;;  %v277_v54 = vld [vmem:[#allocation2 + $0xb0] sm:$0xff]  ;;  %v2728_v55 = vpack.c.bf16 %v291_v48, %v287_v47  ;;  %v282_v56 = vld [vmem:[#allocation2 + $0xd8] sm:$0xff]  ;;  %v2732_v58 = vpack.c.bf16 %v300_v51, %v296_v50  ;;  %v295_v59 = vld [vmem:[#allocation2 + $0x140] sm:$0xff] }
  0x21   :  { %1949 = vmatpush1.bf16.msra.mxu0 %v2701_v31  ;;  %1973 = vmatpush1.bf16.msra.mxu1 %v2709_v37  ;;  %v286_v57 = vld [vmem:[#allocation2 + $0xf8] sm:$0xff]  ;;  %v299_v60 = vld [vmem:[#allocation2 + $0x160] sm:$0xff]  ;;  %v2735_v61 = vpack.c.bf16 %v277_v54, %v273_v53  ;;  %v304_v62 = vld [vmem:[#allocation2 + $0x188] sm:$0xff]  ;;  %v44_v54 = vlaneseq }
  0x22   :  { %1951 = vmatprep.subr.bf16.mxu0 %v2706_v34  ;;  %231 = vmatprep.mubr.f32.mxu1 %v3317_v0  ;;  %v308_v63 = vld [vmem:[#allocation2 + $0x1a8] sm:$0xff]  ;;  %v2739_v1 = vpack.c.bf16 %v286_v57, %v282_v56  ;;  %v281_v2 = vld [vmem:[#allocation2 + $0xd0] sm:$0xff]  ;;  %v2742_v4 = vpack.c.bf16 %v299_v60, %v295_v59  ;;  %v290_v6 = vld [vmem:[#allocation2 + $0x118] sm:$0xff] }
  0x23   :  { %1975 = vmatprep.subr.bf16.mxu1 %v2711_v40  ;;  %v285_v3 = vld [vmem:[#allocation2 + $0xf0] sm:$0xff]  ;;  %v294_v7 = vld [vmem:[#allocation2 + $0x138] sm:$0xff]  ;;  %v2745_v8 = vpack.c.bf16 %v308_v63, %v304_v62  ;;  %v303_v10 = vld [vmem:[#allocation2 + $0x180] sm:$0xff]  ;;  %v45_v56 = vshrl.u32 %v44_v54, 7 }
  0x24   :  { %1884 = vmatmul.mubr.msk.f32.gmra.mrb[6].mxu1 %vm68_vm1, %v39_v25  ;;  %v307_v11 = vld [vmem:[#allocation2 + $0x1a0] sm:$0xff]  ;;  %v2748_v12 = vpack.c.bf16 %v285_v3, %v281_v2  ;;  %v312_v13 = vld [vmem:[#allocation2 + $0x1c8] sm:$0xff]  ;;  %v2751_v16 = vpack.c.bf16 %v294_v7, %v290_v6  ;;  %v289_v18 = vld [vmem:[#allocation2 + $0x110] sm:$0xff] }
  0x25   :  { %1953 = vmatpush1.bf16.msra.mxu0 %v2714_v43  ;;  %1977 = vmatpush1.bf16.msra.mxu1 %v2722_v49  ;;  %v316_v15 = vld [vmem:[#allocation2 + $0x1e8] sm:$0xff]  ;;  %v293_v19 = vld [vmem:[#allocation2 + $0x130] sm:$0xff]  ;;  %v2754_v20 = vpack.c.bf16 %v307_v11, %v303_v10  ;;  %v298_v22 = vld [vmem:[#allocation2 + $0x158] sm:$0xff]  ;;  %v46_v57 = vsub.s32 0, %v45_v56  ;;  %v50_v60 = vsub.s32 1, %v45_v56  ;;  %v54_v2 = vsub.s32 2, %v45_v56 }
  0x26   :  { %1955 = vmatprep.subr.bf16.mxu0 %v2718_v46  ;;  %454 = vmatprep.mubr.f32.mxu1 %v3317_v0  ;;  %v302_v23 = vld [vmem:[#allocation2 + $0x178] sm:$0xff]  ;;  %v2757_v24 = vpack.c.bf16 %v316_v15, %v312_v13  ;;  %v311_v25 = vld [vmem:[#allocation2 + $0x1c0] sm:$0xff]  ;;  %v2760_v28 = vpack.c.bf16 %v293_v19, %v289_v18  ;;  %v297_v30 = vld [vmem:[#allocation2 + $0x150] sm:$0xff]  ;;  %v58_v3 = vsub.s32 3, %v45_v56 }
  0x27   :  { %1979 = vmatprep.subr.bf16.mxu1 %v2725_v52  ;;  %v315_v27 = vld [vmem:[#allocation2 + $0x1e0] sm:$0xff]  ;;  %v2763_v29 = vpack.c.bf16 %v302_v23, %v298_v22  ;;  %v301_v32 = vld [vmem:[#allocation2 + $0x170] sm:$0xff]  ;;  %v306_v35 = vld [vmem:[#allocation2 + $0x198] sm:$0xff] }
  0x28   :  { %v2766_v33 = vpack.c.bf16 %v315_v27, %v311_v25  ;;  %v310_v36 = vld [vmem:[#allocation2 + $0x1b8] sm:$0xff]  ;;  %v2770_v38 = vpack.c.bf16 %v301_v32, %v297_v30  ;;  %v305_v41 = vld [vmem:[#allocation2 + $0x190] sm:$0xff] }
  0x29   :  { %1957 = vmatpush1.bf16.msra.mxu0 %v2728_v55  ;;  %1981 = vmatpush1.bf16.msra.mxu1 %v2735_v61  ;;  %v2773_v39 = vpack.c.bf16 %v310_v36, %v306_v35  ;;  %v309_v42 = vld [vmem:[#allocation2 + $0x1b0] sm:$0xff]  ;;  %v314_v44 = vld [vmem:[#allocation2 + $0x1d8] sm:$0xff] }
  0x2a   :  { %1959 = vmatprep.subr.bf16.mxu0 %v2732_v58  ;;  %1983 = vmatprep.subr.bf16.mxu1 %v2739_v1  ;;  %3331 = vst [vmem:[#allocation10_spill] sm:$0xff] %v2766_v33  ;;  %v318_v45 = vld [vmem:[#allocation2 + $0x1f8] sm:$0xff]  ;;  %v2778_v47 = vpack.c.bf16 %v309_v42, %v305_v41  ;;  %v313_v50 = vld [vmem:[#allocation2 + $0x1d0] sm:$0xff] }
  0x2b   :  { %v2782_v48 = vpack.c.bf16 %v318_v45, %v314_v44  ;;  %v317_v51 = vld [vmem:[#allocation2 + $0x1f0] sm:$0xff] }
  0x2c   :  { %v2788_v53 = vpack.c.bf16 %v317_v51, %v313_v50  ;;  %v42_v59 = vld [vmem:[%s3313_s3] sm:$0xf] }
  0x2d   :  { %1961 = vmatpush1.bf16.msra.mxu0 %v2742_v4  ;;  %1985 = vmatpush1.bf16.msra.mxu1 %v2748_v12  ;;  %3332 = vst [vmem:[#allocation11_spill] sm:$0xff] %v2782_v48  ;;  %v47_v62 = vrot.slane %v42_v59, %v46_v57  ;;  %v51_v63 = vrot.slane %v42_v59, %v50_v60 }
  0x2e   :  { %1963 = vmatprep.subr.bf16.mxu0 %v2745_v8  ;;  %1987 = vmatprep.subr.bf16.mxu1 %v2751_v16  ;;  %3333 = vst [vmem:[#allocation12_spill] sm:$0xff] %v2788_v53  ;;  %v55_v13 = vrot.slane %v42_v59, %v54_v2  ;;  %v59_v15 = vrot.slane %v42_v59, %v58_v3 }
  0x31   :  { %1965 = vmatpush1.bf16.msra.mxu0 %v2754_v20  ;;  %1989 = vmatpush1.bf16.msra.mxu1 %v2760_v28 }
  0x32   :  { %1967 = vmatprep.subr.bf16.mxu0 %v2757_v24  ;;  %1991 = vmatprep.subr.bf16.mxu1 %v2763_v29 }
  0x35   :  { %1969 = vmatpush1.bf16.msra.mxu0 %v2766_v33  ;;  %1993 = vmatpush1.bf16.msra.mxu1 %v2770_v38 }
  0x36   :  { %2003 = vmatprep.subr.bf16.mxu0 %v2670_v5  ;;  %1995 = vmatprep.subr.bf16.mxu1 %v2773_v39 }
  0x38   :  { %384 = vmatmul.mubr.f32.vlgmr.msra.gmra.mrb[0].mxu0 %v3317_v0 }
  0x39   :  { %2005 = vmatpush1.bf16.msra.mxu0 %v2675_v9  ;;  %563 = vmatprep.mubr.f32.mxu0 %v3317_v0 }
  0x3a   :  { %2007 = vmatprep.subr.bf16.mxu0 %v2682_v14  ;;  %1997 = vmatpush1.bf16.msra.mxu1 %v2778_v47 }
  0x3b   :  { %1999 = vmatprep.subr.bf16.mxu1 %v2782_v48 }
  0x3d   :  { %2009 = vmatpush1.bf16.msra.mxu0 %v2686_v17 }
  0x3e   :  { %2011 = vmatprep.subr.bf16.mxu0 %v2690_v21  ;;  %2001 = vmatpush1.bf16.msra.mxu1 %v2788_v53 }
  0x3f   :  { %2035 = vmatprep.subr.bf16.mxu1 %v2697_v26 }
  0x41   :  { %2013 = vmatpush1.bf16.msra.mxu0 %v2701_v31  ;;  %455 = vmatmul.mubr.f32.vlgmr.msra.gmra.mrb[8].mxu1 %v3317_v0 }
  0x42   :  { %2015 = vmatprep.subr.bf16.mxu0 %v2706_v34  ;;  %2037 = vmatpush1.bf16.msra.mxu1 %v2709_v37 }
  0x43   :  { %634 = vmatprep.mubr.f32.mxu1 %v3317_v0  ;;  %2039 = vmatprep.subr.bf16.mxu1 %v2711_v40 }
  0x45   :  { %2017 = vmatpush1.bf16.msra.mxu0 %v2714_v43 }
  0x46   :  { %2019 = vmatprep.subr.bf16.mxu0 %v2718_v46  ;;  %2041 = vmatpush1.bf16.msra.mxu1 %v2722_v49 }
  0x47   :  { %2043 = vmatprep.subr.bf16.mxu1 %v2725_v52 }
  0x49   :  { %2021 = vmatpush1.bf16.msra.mxu0 %v2728_v55 }
  0x4a   :  { %2023 = vmatprep.subr.bf16.mxu0 %v2732_v58  ;;  %2045 = vmatpush1.bf16.msra.mxu1 %v2735_v61 }
  0x4b   :  { %2047 = vmatprep.subr.bf16.mxu1 %v2739_v1 }
  0x4d   :  { %2025 = vmatpush1.bf16.msra.mxu0 %v2742_v4 }
  0x4e   :  { %2027 = vmatprep.subr.bf16.mxu0 %v2745_v8  ;;  %2049 = vmatpush1.bf16.msra.mxu1 %v2748_v12 }
  0x4f   :  { %2051 = vmatprep.subr.bf16.mxu1 %v2751_v16 }
  0x51   :  { %2029 = vmatpush1.bf16.msra.mxu0 %v2754_v20 }
  0x52   :  { %2031 = vmatprep.subr.bf16.mxu0 %v2757_v24  ;;  %2053 = vmatpush1.bf16.msra.mxu1 %v2760_v28 }
  0x53   :  { %2055 = vmatprep.subr.bf16.mxu1 %v2763_v29 }
  0x55   :  { %2033 = vmatpush1.bf16.msra.mxu0 %v2766_v33 }
  0x56   :  { %2067 = vmatprep.subr.bf16.mxu0 %v2670_v5  ;;  %2057 = vmatpush1.bf16.msra.mxu1 %v2770_v38 }
  0x57   :  { %2059 = vmatprep.subr.bf16.mxu1 %v2773_v39 }
  0x5a   :  { %2061 = vmatpush1.bf16.msra.mxu1 %v2778_v47 }
  0x5b   :  { %2063 = vmatprep.subr.bf16.mxu1 %v2782_v48 }
  0x5e   :  { %2065 = vmatpush1.bf16.msra.mxu1 %v2788_v53 }
  0x5f   :  { %2099 = vmatprep.subr.bf16.mxu1 %v2697_v26 }
  0xeb   :  { %v150_v6 = vpop.f32.mrb[0].mxu1 }
  0xec   :  { %v2828_v7 = vadd.f32 %v150_v6, %v47_v62  ;;  %v152_v10 = vpop.f32.mrb[1].mxu1 }
  0xed   :  { %v2830_v11 = vadd.f32 %v152_v10, %v51_v63 }
  0xee   :  { %v487_v18 = vrot.slane %v2828_v7, 1  ;;  %v663_v19 = vrot.slane %v2828_v7, 2  ;;  %v847_v22 = vrot.slane %v2828_v7, 3  ;;  %v1031_v32 = vrot.slane %v2828_v7, 4 }
  0xef   :  { %v156_v23 = vpop.f32.mrb[2].mxu1  ;;  %v488_v25 = vrot.slane %v2830_v11, 1  ;;  %v664_v27 = vrot.slane %v2830_v11, 2  ;;  %v848_v30 = vrot.slane %v2830_v11, 3  ;;  %v1032_v41 = vrot.slane %v2830_v11, 4 }
  0xf0   :  { %v2839_v35 = vadd.f32 %v156_v23, %v47_v62  ;;  %v158_v36 = vpop.f32.mrb[3].mxu1  ;;  %v1215_v42 = vrot.slane %v2828_v7, 5  ;;  %v1216_v44 = vrot.slane %v2830_v11, 5 }
  0xf1   :  { %v2844_v45 = vadd.f32 %v158_v36, %v51_v63 }
  0xf2   :  { %v242_v56 = vrot.slane %v2839_v35, 7  ;;  %v2852_v57 = vsel %vm250_vm2, %v487_v18, %v2839_v35  ;;  %v671_v59 = vrot.slane %v2839_v35, 1  ;;  %v855_v60 = vrot.slane %v2839_v35, 2 }
  0xf3   :  { %3334 = vst [vmem:[#allocation13_spill] sm:$0xff] %v2852_v57  ;;  %v227_v62 = vpop.f32.mrb[4].mxu1  ;;  %v243_v63 = vrot.slane %v2844_v45, 7  ;;  %v2859_v2 = vsel %vm250_vm2, %v488_v25, %v2844_v45  ;;  %v672_v3 = vrot.slane %v2844_v45, 1  ;;  %v856_v6 = vrot.slane %v2844_v45, 2 }
  0xf4   :  { %3335 = vst [vmem:[#allocation14_spill] sm:$0xff] %v2859_v2  ;;  %v2863_v10 = vadd.f32 %v227_v62, %v55_v13  ;;  %v229_v23 = vpop.f32.mrb[5].mxu1  ;;  %v2867_v18 = vsel %vm250_vm2, %v2828_v7, %v242_v56  ;;  %v2870_v36 = vsel %vm250_vm2, %v663_v19, %v671_v59  ;;  %v2873_v0 = vsel %vm250_vm2, %v847_v22, %v855_v60 }
  0xf5   :  { %3336 = vst [vmem:[#allocation15_spill] sm:$0xff] %v2870_v36  ;;  %3337 = vst [vmem:[#allocation16_spill] sm:$0xff] %v2873_v0  ;;  %v2875_v54 = vadd.f32 %v229_v23, %v59_v15  ;;  %v2879_v25 = vsel %vm250_vm2, %v2830_v11, %v243_v63  ;;  %v2882_v62 = vsel %vm250_vm2, %v664_v27, %v672_v3  ;;  %v1039_v22 = vrot.slane %v2839_v35, 3 }
  0xf6   :  { %3338 = vst [vmem:[#allocation17_spill] sm:$0xff] %v2882_v62  ;;  %v2885_v51 = vsel %vm250_vm2, %v848_v30, %v856_v6  ;;  %v489_v56 = vrot.slane %v2863_v10, 1  ;;  %v665_v19 = vrot.slane %v2863_v10, 2  ;;  %v849_v59 = vrot.slane %v2863_v10, 3 }
  0xf7   :  { %3339 = vst [vmem:[#allocation18_spill] sm:$0xff] %v2885_v51  ;;  %v233_v60 = vpop.f32.mrb[6].mxu1  ;;  %v490_v23 = vrot.slane %v2875_v54, 1  ;;  %v666_v63 = vrot.slane %v2875_v54, 2  ;;  %v850_v50 = vrot.slane %v2875_v54, 3  ;;  %v1033_v27 = vrot.slane %v2863_v10, 4 }
  0xf8   :  { %v234_v3 = vadd.f32 %v233_v60, %v55_v13  ;;  %v235_v30 = vpop.f32.mrb[7].mxu1  ;;  %v2896_v6 = vsel %vm250_vm2, %v1031_v32, %v1039_v22  ;;  %v1040_v51 = vrot.slane %v2844_v45, 3  ;;  %v1034_v0 = vrot.slane %v2875_v54, 4 }
  0xf9   :  { %3340 = vst [vmem:[#allocation19_spill] sm:$0xff] %v2896_v6  ;;  %v236_v62 = vadd.f32 %v235_v30, %v59_v15  ;;  %v1223_v36 = vrot.slane %v2839_v35, 4  ;;  %v1217_v2 = vrot.slane %v2863_v10, 5  ;;  %v1224_v57 = vrot.slane %v2844_v45, 4 }
  0xfa   :  { %v244_v26 = vrot.slane %v234_v3, 7  ;;  %v2904_v5 = vsel %vm250_vm2, %v489_v56, %v234_v3  ;;  %v673_v13 = vrot.slane %v234_v3, 1  ;;  %v857_v60 = vrot.slane %v234_v3, 2 }
  0xfb   :  { %3341 = vst [vmem:[#allocation20_spill] sm:$0xff] %v2904_v5  ;;  %v245_v53 = vrot.slane %v236_v62, 7  ;;  %v2907_v32 = vsel %vm250_vm2, %v490_v23, %v236_v62  ;;  %v674_v22 = vrot.slane %v236_v62, 1  ;;  %v858_v6 = vrot.slane %v236_v62, 2 }
  0xfc   :  { %3342 = vst [vmem:[#allocation21_spill] sm:$0xff] %v2907_v32  ;;  %v253_v15 = vsel %vm250_vm2, %v2863_v10, %v244_v26  ;;  %v2912_v30 = vsel %vm250_vm2, %v665_v19, %v673_v13  ;;  %v2915_v33 = vsel %vm250_vm2, %v849_v59, %v857_v60  ;;  %v1041_v48 = vrot.slane %v234_v3, 3 }
  0xfd   :  { %v254_v56 = vsel %vm250_vm2, %v2875_v54, %v245_v53  ;;  %v2920_v5 = vsel %vm250_vm2, %v666_v63, %v674_v22  ;;  %v2923_v23 = vsel %vm250_vm2, %v850_v50, %v858_v6  ;;  %v2926_v32 = vsel %vm250_vm2, %v1032_v41, %v1040_v51 }
  0xfe   :  { %v2929_v26 = vsel %vm250_vm2, %v1033_v27, %v1041_v48  ;;  %v1042_v19 = vrot.slane %v236_v62, 3  ;;  %v2932_v59 = vsel %vm250_vm2, %v1215_v42, %v1223_v36  ;;  %v1225_v13 = vrot.slane %v234_v3, 4 }
  0xff   :  { %v2935_v60 = vsel %vm250_vm2, %v1216_v44, %v1224_v57  ;;  %v1218_v53 = vrot.slane %v2875_v54, 5  ;;  %v1226_v63 = vrot.slane %v236_v62, 4  ;;  %v1407_v50 = vrot.slane %v2839_v35, 5 }
 0x100   :  { %v2940_v6 = vsel %vm250_vm2, %v1034_v0, %v1042_v19  ;;  %v2943_v41 = vsel %vm250_vm2, %v1217_v2, %v1225_v13  ;;  %v1401_v48 = vrot.slane %v2863_v10, 6  ;;  %v1409_v51 = vrot.slane %v234_v3, 5 }
 0x101   :  { %v2947_v42 = vsel %vm250_vm2, %v1218_v53, %v1226_v63  ;;  %v3344_v44 = vrot.slane %v2828_v7, 6  ;;  %v1408_v36 = vrot.slane %v2844_v45, 5  ;;  %v1584_v27 = vrot.slane %v2830_v11, 7 }
 0x102   :  { %3343 = vst [vmem:[#allocation22_spill] sm:$0xff] %v2947_v42  ;;  %v2957_v0 = vsel %vm250_vm2, %v1401_v48, %v1409_v51  ;;  %v1402_v2 = vrot.slane %v2875_v54, 6  ;;  %v1410_v22 = vrot.slane %v236_v62, 5  ;;  %v1591_v19 = vrot.slane %v2839_v35, 6 }
 0x103   :  { %v2952_v57 = vsel %vm250_vm2, %v3344_v44, %v1407_v50  ;;  %3346 = vst [vmem:[#allocation24_spill] sm:$0xff] %v2957_v0  ;;  %v3347_v13 = vrot.slane %v2830_v11, 6  ;;  %v1585_v63 = vrot.slane %v2863_v10, 7  ;;  %v1593_v50 = vrot.slane %v234_v3, 6 }
 0x104   :  { %3345 = vst [vmem:[#allocation23_spill] sm:$0xff] %v2952_v57  ;;  %v1592_v44 = vrot.slane %v2844_v45, 6  ;;  %v2969_v57 = vsel %vm250_vm2, %v1402_v2, %v1410_v22  ;;  %v3350_v48 = vrot.slane %v2828_v7, 7  ;;  %v1586_v35 = vrot.slane %v2875_v54, 7 }
 0x105   :  { %v2964_v53 = vsel %vm250_vm2, %v3347_v13, %v1408_v36  ;;  %3349 = vst [vmem:[#allocation26_spill] sm:$0xff] %v2969_v57  ;;  %v1594_v0 = vrot.slane %v236_v62, 6  ;;  %v2978_v11 = vsel %vm250_vm2, %v1585_v63, %v1593_v50 }
 0x106   :  { %3348 = vst [vmem:[#allocation25_spill] sm:$0xff] %v2964_v53  ;;  %v2974_v51 = vsel %vm250_vm2, %v3350_v48, %v1591_v19  ;;  %3352 = vst [vmem:[#allocation28_spill] sm:$0xff] %v2978_v11  ;;  %v2981_v36 = vsel %vm250_vm2, %v1584_v27, %v1592_v44 }
 0x107   :  { %3351 = vst [vmem:[#allocation27_spill] sm:$0xff] %v2974_v51  ;;  %3353 = vst [vmem:[#allocation29_spill] sm:$0xff] %v2981_v36  ;;  %v2984_v10 = vsel %vm250_vm2, %v1586_v35, %v1594_v0 }
 0x108   :  { %3354 = vst [vmem:[#allocation30_spill] sm:$0xff] %v2984_v10 }
 0x10b   :  { %v385_v45 = vpop.f32.mrb[0].mxu0 }
 0x10c   :  { %v461_v3 = vadd.f32 %v385_v45, %v2867_v18  ;;  %v387_v2 = vpop.f32.mrb[1].mxu0 }
 0x10d   :  { %v462_v7 = vadd.f32 %v387_v2, %v2879_v25 }
 0x10e   :  { %v465_v22 = vmul.f32 0.5, %v461_v3 }
 0x10f   :  { %v469_v19 = vmul.f32 0.5, %v462_v7 }
 0x110   :  { %2483 = vtanh.f32 %v465_v22 }
 0x111   :  { %2485 = vtanh.f32 %v469_v19  ;;  %v3355_v19 = vmov 0.0  }
 0x114   :  { %v456_v54 = vpop.f32.mrb[8].mxu1 }
 0x115   :  { %v463_v62 = vadd.f32 %v456_v54, %v253_v15  ;;  %v458_v13 = vpop.f32.mrb[9].mxu1  ;;  %v3357_v54 = vld [vmem:[#allocation10_spill] sm:$0xff] }
 0x116   :  { %v464_v63 = vadd.f32 %v458_v13, %v254_v56  ;;  %v3359_v13 = vld [vmem:[#allocation8_spill] sm:$0xff] }
 0x117   :  { %2487 = vtanh.f32 %v463_v62  ;;  %v3358_v62 = vld [vmem:[#allocation12_spill] sm:$0xff] }
 0x118   :  { %v474_v44 = vmul.f32 0.5, %v464_v63  ;;  %v3360_v63 = vld [vmem:[#allocation9_spill] sm:$0xff] }
 0x11a   :  { %v2484_v27 = vpop.eup %2483  ;;  %2489 = vtanh.f32 %v474_v44  ;;  %v3361_v44 = vld [vmem:[#allocation13_spill] sm:$0xff] }
 0x11b   :  { %v2486_v50 = vpop.eup %2485  ;;  %v467_v48 = vmul.f32 0.5, %v2484_v27 }
 0x11c   :  { %v471_v0 = vmul.f32 0.5, %v2486_v50 }
 0x11d   :  { %v468_v18 = vadd.f32 0.5, %v467_v48  ;;  %v3362_v48 = vld [vmem:[#allocation20_spill] sm:$0xff] }
 0x11e   :  { %v472_v35 = vadd.f32 0.5, %v471_v0 }
 0x120   :  { %v478_v10 = vmul.f32 0.0, %v472_v35 }
 0x121   :  { %v2488_v45 = vpop.eup %2487 }
 0x122   :  { %v479_v25 = vmul.f32 %v2488_v45, %v468_v18 }
 0x124   :  { %v2988_v3 = vadd.f32 %v479_v25, %v478_v10  ;;  %v2490_v2 = vpop.eup %2489  ;;  %v3356_v10 = vld [vmem:[#allocation11_spill] sm:$0xff]  ;;  %v3363_v25 = vld [vmem:[#allocation14_spill] sm:$0xff] }
 0x125   :  { %v476_v15 = vmul.f32 0.5, %v2490_v2 }
 0x126   :  { %2491 = vtanh.f32 %v2988_v3 }
 0x127   :  { %v477_v7 = vadd.f32 0.5, %v476_v15  ;;  %v3364_v15 = vld [vmem:[#allocation21_spill] sm:$0xff] }
 0x130   :  { %v2492_v56 = vpop.eup %2491 }
 0x131   :  { %v482_v22 = vmul.f32 %v2492_v56, %v477_v7 }
 0x133   :  { %564 = vmatmul.mubr.f32.vlgmr.msra.gmra.mrb[2].mxu0 %v482_v22  ;;  %635 = vmatmul.mubr.f32.vlgmr.msra.gmra.mrb[10].mxu1 %v482_v22 }
 0x134   :  { %2069 = vmatpush1.bf16.msra.mxu0 %v2675_v9  ;;  %2101 = vmatpush1.bf16.msra.mxu1 %v2709_v37 }
 0x135   :  { %2071 = vmatprep.subr.bf16.mxu0 %v2682_v14  ;;  %2103 = vmatprep.subr.bf16.mxu1 %v2711_v40 }
 0x136   :  { %747 = vmatprep.mubr.f32.mxu0 %v3355_v19  ;;  %818 = vmatprep.mubr.f32.mxu1 %v3355_v19 }
 0x138   :  { %2073 = vmatpush1.bf16.msra.mxu0 %v2686_v17  ;;  %2105 = vmatpush1.bf16.msra.mxu1 %v2722_v49 }
 0x139   :  { %2075 = vmatprep.subr.bf16.mxu0 %v2690_v21  ;;  %2107 = vmatprep.subr.bf16.mxu1 %v2725_v52 }
 0x13c   :  { %2077 = vmatpush1.bf16.msra.mxu0 %v2701_v31  ;;  %2109 = vmatpush1.bf16.msra.mxu1 %v2735_v61 }
 0x13d   :  { %2079 = vmatprep.subr.bf16.mxu0 %v2706_v34  ;;  %2111 = vmatprep.subr.bf16.mxu1 %v2739_v1 }
 0x140   :  { %2081 = vmatpush1.bf16.msra.mxu0 %v2714_v43  ;;  %2113 = vmatpush1.bf16.msra.mxu1 %v2748_v12 }
 0x141   :  { %2083 = vmatprep.subr.bf16.mxu0 %v2718_v46  ;;  %2115 = vmatprep.subr.bf16.mxu1 %v2751_v16 }
 0x144   :  { %2085 = vmatpush1.bf16.msra.mxu0 %v2728_v55  ;;  %2117 = vmatpush1.bf16.msra.mxu1 %v2760_v28 }
 0x145   :  { %2087 = vmatprep.subr.bf16.mxu0 %v2732_v58  ;;  %2119 = vmatprep.subr.bf16.mxu1 %v2763_v29 }
 0x148   :  { %2089 = vmatpush1.bf16.msra.mxu0 %v2742_v4  ;;  %2121 = vmatpush1.bf16.msra.mxu1 %v2770_v38 }
 0x149   :  { %2091 = vmatprep.subr.bf16.mxu0 %v2745_v8  ;;  %2123 = vmatprep.subr.bf16.mxu1 %v2773_v39 }
 0x14c   :  { %2093 = vmatpush1.bf16.msra.mxu0 %v2754_v20  ;;  %2125 = vmatpush1.bf16.msra.mxu1 %v2778_v47 }
 0x14d   :  { %2095 = vmatprep.subr.bf16.mxu0 %v2757_v24  ;;  %2127 = vmatprep.subr.bf16.mxu1 %v3356_v10 }
 0x150   :  { %2097 = vmatpush1.bf16.msra.mxu0 %v3357_v54  ;;  %2129 = vmatpush1.bf16.msra.mxu1 %v3358_v62 }
 0x151   :  { %2131 = vmatprep.subr.bf16.mxu0 %v3359_v13  ;;  %2163 = vmatprep.subr.bf16.mxu1 %v3360_v63 }
 0x206   :  { %v565_v27 = vpop.f32.mrb[2].mxu0  ;;  %v636_v50 = vpop.f32.mrb[10].mxu1 }
 0x207   :  { %v641_v0 = vadd.f32 %v565_v27, %v3361_v44  ;;  %v643_v35 = vadd.f32 %v636_v50, %v3362_v48  ;;  %v567_v18 = vpop.f32.mrb[3].mxu0  ;;  %v638_v45 = vpop.f32.mrb[11].mxu1 }
 0x208   :  { %v642_v2 = vadd.f32 %v567_v18, %v3363_v25  ;;  %v644_v7 = vadd.f32 %v638_v45, %v3364_v15  ;;  %v3366_v15 = vld [vmem:[#allocation17_spill] sm:$0xff] }
 0x209   :  { %v645_v56 = vmul.f32 0.5, %v641_v0 }
 0x20a   :  { %v649_v22 = vmul.f32 0.5, %v642_v2  ;;  %v654_v36 = vmul.f32 0.5, %v644_v7 }
 0x20b   :  { %2493 = vtanh.f32 %v645_v56 }
 0x20c   :  { %2495 = vtanh.f32 %v649_v22 }
 0x20d   :  { %2497 = vtanh.f32 %v643_v35 }
 0x20e   :  { %2499 = vtanh.f32 %v654_v36 }
 0x215   :  { %v2494_v11 = vpop.eup %2493 }
 0x216   :  { %v2496_v51 = vpop.eup %2495  ;;  %v647_v57 = vmul.f32 0.5, %v2494_v11 }
 0x217   :  { %v651_v53 = vmul.f32 0.5, %v2496_v51  ;;  %v2498_v44 = vpop.eup %2497 }
 0x218   :  { %v648_v27 = vadd.f32 0.5, %v647_v57  ;;  %v2500_v0 = vpop.eup %2499 }
 0x219   :  { %v652_v50 = vadd.f32 0.5, %v651_v53  ;;  %v656_v45 = vmul.f32 0.5, %v2500_v0  ;;  %v3365_v53 = vld [vmem:[#allocation15_spill] sm:$0xff] }
 0x21a   :  { %v659_v48 = vmul.f32 %v2498_v44, %v648_v27 }
 0x21b   :  { %v658_v42 = vmul.f32 %v652_v50, %v2988_v3  ;;  %v657_v25 = vadd.f32 0.5, %v656_v45 }
 0x21d   :  { %v3030_v18 = vadd.f32 %v659_v48, %v658_v42 }
 0x21f   :  { %2501 = vtanh.f32 %v3030_v18 }
 0x229   :  { %v2502_v35 = vpop.eup %2501 }
 0x22a   :  { %v662_v2 = vmul.f32 %v2502_v35, %v657_v25 }
 0x22c   :  { %748 = vmatmul.mubr.f32.vlgmr.msra.gmra.mrb[4].mxu0 %v662_v2  ;;  %819 = vmatmul.mubr.f32.vlgmr.msra.gmra.mrb[12].mxu1 %v662_v2 }
 0x22d   :  { %2133 = vmatpush1.bf16.msra.mxu0 %v2675_v9  ;;  %2165 = vmatpush1.bf16.msra.mxu1 %v2709_v37 }
 0x22e   :  { %2135 = vmatprep.subr.bf16.mxu0 %v2682_v14  ;;  %2167 = vmatprep.subr.bf16.mxu1 %v2711_v40 }
 0x22f   :  { %931 = vmatprep.mubr.f32.mxu0 %v3355_v19  ;;  %1002 = vmatprep.mubr.f32.mxu1 %v3355_v19 }
 0x231   :  { %2137 = vmatpush1.bf16.msra.mxu0 %v2686_v17  ;;  %2169 = vmatpush1.bf16.msra.mxu1 %v2722_v49 }
 0x232   :  { %2139 = vmatprep.subr.bf16.mxu0 %v2690_v21  ;;  %2171 = vmatprep.subr.bf16.mxu1 %v2725_v52 }
 0x235   :  { %2141 = vmatpush1.bf16.msra.mxu0 %v2701_v31  ;;  %2173 = vmatpush1.bf16.msra.mxu1 %v2735_v61 }
 0x236   :  { %2143 = vmatprep.subr.bf16.mxu0 %v2706_v34  ;;  %2175 = vmatprep.subr.bf16.mxu1 %v2739_v1 }
 0x239   :  { %2145 = vmatpush1.bf16.msra.mxu0 %v2714_v43  ;;  %2177 = vmatpush1.bf16.msra.mxu1 %v2748_v12 }
 0x23a   :  { %2147 = vmatprep.subr.bf16.mxu0 %v2718_v46  ;;  %2179 = vmatprep.subr.bf16.mxu1 %v2751_v16 }
 0x23d   :  { %2149 = vmatpush1.bf16.msra.mxu0 %v2728_v55  ;;  %2181 = vmatpush1.bf16.msra.mxu1 %v2760_v28 }
 0x23e   :  { %2151 = vmatprep.subr.bf16.mxu0 %v2732_v58  ;;  %2183 = vmatprep.subr.bf16.mxu1 %v2763_v29 }
 0x241   :  { %2153 = vmatpush1.bf16.msra.mxu0 %v2742_v4  ;;  %2185 = vmatpush1.bf16.msra.mxu1 %v2770_v38 }
 0x242   :  { %2155 = vmatprep.subr.bf16.mxu0 %v2745_v8  ;;  %2187 = vmatprep.subr.bf16.mxu1 %v2773_v39 }
 0x245   :  { %2157 = vmatpush1.bf16.msra.mxu0 %v2754_v20  ;;  %2189 = vmatpush1.bf16.msra.mxu1 %v2778_v47 }
 0x246   :  { %2159 = vmatprep.subr.bf16.mxu0 %v2757_v24  ;;  %2191 = vmatprep.subr.bf16.mxu1 %v3356_v10 }
 0x249   :  { %2161 = vmatpush1.bf16.msra.mxu0 %v3357_v54  ;;  %2193 = vmatpush1.bf16.msra.mxu1 %v3358_v62 }
 0x24a   :  { %2195 = vmatprep.subr.bf16.mxu0 %v3359_v13  ;;  %2227 = vmatprep.subr.bf16.mxu1 %v3360_v63 }
 0x2ff   :  { %v749_v42 = vpop.f32.mrb[4].mxu0  ;;  %v820_v57 = vpop.f32.mrb[12].mxu1 }
 0x300   :  { %v825_v51 = vadd.f32 %v749_v42, %v3365_v53  ;;  %v827_v11 = vadd.f32 %v820_v57, %v2912_v30  ;;  %v751_v36 = vpop.f32.mrb[5].mxu0  ;;  %v822_v3 = vpop.f32.mrb[13].mxu1 }
 0x301   :  { %v826_v7 = vadd.f32 %v751_v36, %v3366_v15  ;;  %v828_v56 = vadd.f32 %v822_v3, %v2920_v5  ;;  %v3367_v15 = vld [vmem:[#allocation16_spill] sm:$0xff] }
 0x302   :  { %v829_v22 = vmul.f32 0.5, %v825_v51 }
 0x303   :  { %v833_v27 = vmul.f32 0.5, %v826_v7  ;;  %v838_v44 = vmul.f32 0.5, %v828_v56 }
 0x304   :  { %2503 = vtanh.f32 %v829_v22 }
 0x305   :  { %2505 = vtanh.f32 %v833_v27 }
 0x306   :  { %2507 = vtanh.f32 %v827_v11 }
 0x307   :  { %2509 = vtanh.f32 %v838_v44  ;;  %v3368_v44 = vld [vmem:[#allocation18_spill] sm:$0xff] }
 0x30e   :  { %v2504_v50 = vpop.eup %2503 }
 0x30f   :  { %v2506_v48 = vpop.eup %2505  ;;  %v831_v0 = vmul.f32 0.5, %v2504_v50 }
 0x310   :  { %v835_v45 = vmul.f32 0.5, %v2506_v48  ;;  %v2508_v35 = vpop.eup %2507 }
 0x311   :  { %v832_v25 = vadd.f32 0.5, %v831_v0  ;;  %v2510_v5 = vpop.eup %2509 }
 0x312   :  { %v836_v30 = vadd.f32 0.5, %v835_v45  ;;  %v840_v53 = vmul.f32 0.5, %v2510_v5 }
 0x313   :  { %v843_v2 = vmul.f32 %v2508_v35, %v832_v25 }
 0x314   :  { %v842_v42 = vmul.f32 %v836_v30, %v3030_v18  ;;  %v841_v51 = vadd.f32 0.5, %v840_v53 }
 0x316   :  { %v3072_v57 = vadd.f32 %v843_v2, %v842_v42 }
 0x318   :  { %2511 = vtanh.f32 %v3072_v57 }
 0x322   :  { %v2512_v11 = vpop.eup %2511 }
 0x323   :  { %v846_v36 = vmul.f32 %v2512_v11, %v841_v51 }
 0x325   :  { %932 = vmatmul.mubr.f32.vlgmr.msra.gmra.mrb[6].mxu0 %v846_v36  ;;  %1003 = vmatmul.mubr.f32.vlgmr.msra.gmra.mrb[14].mxu1 %v846_v36 }
 0x326   :  { %2197 = vmatpush1.bf16.msra.mxu0 %v2675_v9  ;;  %2229 = vmatpush1.bf16.msra.mxu1 %v2709_v37 }
 0x327   :  { %2199 = vmatprep.subr.bf16.mxu0 %v2682_v14  ;;  %2231 = vmatprep.subr.bf16.mxu1 %v2711_v40 }
 0x328   :  { %1115 = vmatprep.mubr.f32.mxu0 %v3355_v19  ;;  %1186 = vmatprep.mubr.f32.mxu1 %v3355_v19 }
 0x32a   :  { %2201 = vmatpush1.bf16.msra.mxu0 %v2686_v17  ;;  %2233 = vmatpush1.bf16.msra.mxu1 %v2722_v49 }
 0x32b   :  { %2203 = vmatprep.subr.bf16.mxu0 %v2690_v21  ;;  %2235 = vmatprep.subr.bf16.mxu1 %v2725_v52 }
 0x32e   :  { %2205 = vmatpush1.bf16.msra.mxu0 %v2701_v31  ;;  %2237 = vmatpush1.bf16.msra.mxu1 %v2735_v61 }
 0x32f   :  { %2207 = vmatprep.subr.bf16.mxu0 %v2706_v34  ;;  %2239 = vmatprep.subr.bf16.mxu1 %v2739_v1 }
 0x332   :  { %2209 = vmatpush1.bf16.msra.mxu0 %v2714_v43  ;;  %2241 = vmatpush1.bf16.msra.mxu1 %v2748_v12 }
 0x333   :  { %2211 = vmatprep.subr.bf16.mxu0 %v2718_v46  ;;  %2243 = vmatprep.subr.bf16.mxu1 %v2751_v16 }
 0x336   :  { %2213 = vmatpush1.bf16.msra.mxu0 %v2728_v55  ;;  %2245 = vmatpush1.bf16.msra.mxu1 %v2760_v28 }
 0x337   :  { %2215 = vmatprep.subr.bf16.mxu0 %v2732_v58  ;;  %2247 = vmatprep.subr.bf16.mxu1 %v2763_v29 }
 0x33a   :  { %2217 = vmatpush1.bf16.msra.mxu0 %v2742_v4  ;;  %2249 = vmatpush1.bf16.msra.mxu1 %v2770_v38 }
 0x33b   :  { %2219 = vmatprep.subr.bf16.mxu0 %v2745_v8  ;;  %2251 = vmatprep.subr.bf16.mxu1 %v2773_v39 }
 0x33e   :  { %2221 = vmatpush1.bf16.msra.mxu0 %v2754_v20  ;;  %2253 = vmatpush1.bf16.msra.mxu1 %v2778_v47 }
 0x33f   :  { %2223 = vmatprep.subr.bf16.mxu0 %v2757_v24  ;;  %2255 = vmatprep.subr.bf16.mxu1 %v3356_v10 }
 0x342   :  { %2225 = vmatpush1.bf16.msra.mxu0 %v3357_v54  ;;  %2257 = vmatpush1.bf16.msra.mxu1 %v3358_v62 }
 0x343   :  { %2259 = vmatprep.subr.bf16.mxu0 %v3359_v13  ;;  %2291 = vmatprep.subr.bf16.mxu1 %v3360_v63 }
 0x3f8   :  { %v933_v18 = vpop.f32.mrb[6].mxu0  ;;  %v1004_v3 = vpop.f32.mrb[14].mxu1 }
 0x3f9   :  { %v1009_v7 = vadd.f32 %v933_v18, %v3367_v15  ;;  %v1011_v56 = vadd.f32 %v1004_v3, %v2915_v33  ;;  %v935_v22 = vpop.f32.mrb[7].mxu0  ;;  %v1006_v27 = vpop.f32.mrb[15].mxu1 }
 0x3fa   :  { %v1010_v50 = vadd.f32 %v935_v22, %v3368_v44  ;;  %v1012_v48 = vadd.f32 %v1006_v27, %v2923_v23  ;;  %v3369_v22 = vld [vmem:[#allocation19_spill] sm:$0xff] }
 0x3fb   :  { %v1013_v0 = vmul.f32 0.5, %v1009_v7 }
 0x3fc   :  { %v1017_v45 = vmul.f32 0.5, %v1010_v50  ;;  %v1022_v25 = vmul.f32 0.5, %v1012_v48 }
 0x3fd   :  { %2513 = vtanh.f32 %v1013_v0 }
 0x3fe   :  { %2515 = vtanh.f32 %v1017_v45 }
 0x3ff   :  { %2517 = vtanh.f32 %v1011_v56 }
 0x400   :  { %2519 = vtanh.f32 %v1022_v25 }
 0x407   :  { %v2514_v35 = vpop.eup %2513 }
 0x408   :  { %v2516_v30 = vpop.eup %2515  ;;  %v1015_v2 = vmul.f32 0.5, %v2514_v35 }
 0x409   :  { %v1019_v42 = vmul.f32 0.5, %v2516_v30  ;;  %v2518_v53 = vpop.eup %2517 }
 0x40a   :  { %v1016_v5 = vadd.f32 0.5, %v1015_v2  ;;  %v2520_v23 = vpop.eup %2519 }
 0x40b   :  { %v1020_v33 = vadd.f32 0.5, %v1019_v42  ;;  %v1024_v18 = vmul.f32 0.5, %v2520_v23 }
 0x40c   :  { %v1027_v51 = vmul.f32 %v2518_v53, %v1016_v5 }
 0x40d   :  { %v1026_v11 = vmul.f32 %v1020_v33, %v3072_v57  ;;  %v1025_v3 = vadd.f32 0.5, %v1024_v18 }
 0x40f   :  { %v3114_v36 = vadd.f32 %v1027_v51, %v1026_v11 }
 0x411   :  { %2521 = vtanh.f32 %v3114_v36 }
 0x41b   :  { %v2522_v15 = vpop.eup %2521 }
 0x41c   :  { %v1030_v7 = vmul.f32 %v2522_v15, %v1025_v3 }
 0x41e   :  { %1116 = vmatmul.mubr.f32.vlgmr.msra.gmra.mrb[8].mxu0 %v1030_v7  ;;  %1187 = vmatmul.mubr.f32.vlgmr.msra.gmra.mrb[16].mxu1 %v1030_v7 }
 0x41f   :  { %2261 = vmatpush1.bf16.msra.mxu0 %v2675_v9  ;;  %2293 = vmatpush1.bf16.msra.mxu1 %v2709_v37 }
 0x420   :  { %2263 = vmatprep.subr.bf16.mxu0 %v2682_v14  ;;  %2295 = vmatprep.subr.bf16.mxu1 %v2711_v40 }
 0x421   :  { %1299 = vmatprep.mubr.f32.mxu0 %v3355_v19  ;;  %1370 = vmatprep.mubr.f32.mxu1 %v3355_v19 }
 0x423   :  { %2265 = vmatpush1.bf16.msra.mxu0 %v2686_v17  ;;  %2297 = vmatpush1.bf16.msra.mxu1 %v2722_v49 }
 0x424   :  { %2267 = vmatprep.subr.bf16.mxu0 %v2690_v21  ;;  %2299 = vmatprep.subr.bf16.mxu1 %v2725_v52 }
 0x427   :  { %2269 = vmatpush1.bf16.msra.mxu0 %v2701_v31  ;;  %2301 = vmatpush1.bf16.msra.mxu1 %v2735_v61 }
 0x428   :  { %2271 = vmatprep.subr.bf16.mxu0 %v2706_v34  ;;  %2303 = vmatprep.subr.bf16.mxu1 %v2739_v1 }
 0x42b   :  { %2273 = vmatpush1.bf16.msra.mxu0 %v2714_v43  ;;  %2305 = vmatpush1.bf16.msra.mxu1 %v2748_v12 }
 0x42c   :  { %2275 = vmatprep.subr.bf16.mxu0 %v2718_v46  ;;  %2307 = vmatprep.subr.bf16.mxu1 %v2751_v16 }
 0x42f   :  { %2277 = vmatpush1.bf16.msra.mxu0 %v2728_v55  ;;  %2309 = vmatpush1.bf16.msra.mxu1 %v2760_v28 }
 0x430   :  { %2279 = vmatprep.subr.bf16.mxu0 %v2732_v58  ;;  %2311 = vmatprep.subr.bf16.mxu1 %v2763_v29 }
 0x433   :  { %2281 = vmatpush1.bf16.msra.mxu0 %v2742_v4  ;;  %2313 = vmatpush1.bf16.msra.mxu1 %v2770_v38 }
 0x434   :  { %2283 = vmatprep.subr.bf16.mxu0 %v2745_v8  ;;  %2315 = vmatprep.subr.bf16.mxu1 %v2773_v39 }
 0x437   :  { %2285 = vmatpush1.bf16.msra.mxu0 %v2754_v20  ;;  %2317 = vmatpush1.bf16.msra.mxu1 %v2778_v47 }
 0x438   :  { %2287 = vmatprep.subr.bf16.mxu0 %v2757_v24  ;;  %2319 = vmatprep.subr.bf16.mxu1 %v3356_v10 }
 0x43b   :  { %2289 = vmatpush1.bf16.msra.mxu0 %v3357_v54  ;;  %2321 = vmatpush1.bf16.msra.mxu1 %v3358_v62 }
 0x43c   :  { %2323 = vmatprep.subr.bf16.mxu0 %v3359_v13  ;;  %2355 = vmatprep.subr.bf16.mxu1 %v3360_v63 }
 0x4f1   :  { %v1117_v57 = vpop.f32.mrb[8].mxu0  ;;  %v1188_v56 = vpop.f32.mrb[16].mxu1 }
 0x4f2   :  { %v1193_v27 = vadd.f32 %v1117_v57, %v3369_v22  ;;  %v1195_v44 = vadd.f32 %v1188_v56, %v2929_v26  ;;  %v1119_v50 = vpop.f32.mrb[9].mxu0  ;;  %v1190_v48 = vpop.f32.mrb[17].mxu1 }
 0x4f3   :  { %v1194_v0 = vadd.f32 %v1119_v50, %v2926_v32  ;;  %v1196_v45 = vadd.f32 %v1190_v48, %v2940_v6  ;;  %v3370_v48 = vld [vmem:[#allocation22_spill] sm:$0xff] }
 0x4f4   :  { %v1197_v25 = vmul.f32 0.5, %v1193_v27 }
 0x4f5   :  { %v1201_v35 = vmul.f32 0.5, %v1194_v0  ;;  %v1206_v30 = vmul.f32 0.5, %v1196_v45 }
 0x4f6   :  { %2523 = vtanh.f32 %v1197_v25 }
 0x4f7   :  { %2525 = vtanh.f32 %v1201_v35 }
 0x4f8   :  { %2527 = vtanh.f32 %v1195_v44 }
 0x4f9   :  { %2529 = vtanh.f32 %v1206_v30 }
 0x500   :  { %v2524_v2 = vpop.eup %2523 }
 0x501   :  { %v2526_v42 = vpop.eup %2525  ;;  %v1199_v5 = vmul.f32 0.5, %v2524_v2 }
 0x502   :  { %v1203_v53 = vmul.f32 0.5, %v2526_v42  ;;  %v2528_v51 = vpop.eup %2527 }
 0x503   :  { %v1200_v33 = vadd.f32 0.5, %v1199_v5  ;;  %v2530_v6 = vpop.eup %2529 }
 0x504   :  { %v1204_v26 = vadd.f32 0.5, %v1203_v53  ;;  %v1208_v18 = vmul.f32 0.5, %v2530_v6  ;;  %v1768_v6 = vld [vmem:[%s3314_s4 + $0x8] sm:$0xff] }
 0x505   :  { %v1211_v11 = vmul.f32 %v2528_v51, %v1200_v33 }
 0x506   :  { %v1210_v23 = vmul.f32 %v1204_v26, %v3114_v36  ;;  %v1209_v3 = vadd.f32 0.5, %v1208_v18 }
 0x508   :  { %v3156_v32 = vadd.f32 %v1211_v11, %v1210_v23 }
 0x50a   :  { %2531 = vtanh.f32 %v3156_v32 }
 0x514   :  { %v2532_v15 = vpop.eup %2531 }
 0x515   :  { %v1214_v7 = vmul.f32 %v2532_v15, %v1209_v3  ;;  %v2615_v3 = vmov 0.0|0.0   ;;  %v1769_v15 = vld [vmem:[%s3314_s4 + $0x10] sm:$0xff] }
 0x517   :  { %1300 = vmatmul.mubr.f32.vlgmr.msra.gmra.mrb[10].mxu0 %v1214_v7  ;;  %1371 = vmatmul.mubr.f32.vlgmr.msra.gmra.mrb[18].mxu1 %v1214_v7  ;;  %v1770_v7 = vld [vmem:[%s3314_s4 + $0x18] sm:$0xff] }
 0x518   :  { %2325 = vmatpush1.bf16.msra.mxu0 %v2675_v9  ;;  %2357 = vmatpush1.bf16.msra.mxu1 %v2709_v37 }
 0x519   :  { %2327 = vmatprep.subr.bf16.mxu0 %v2682_v14  ;;  %2359 = vmatprep.subr.bf16.mxu1 %v2711_v40 }
 0x51a   :  { %1483 = vmatprep.mubr.f32.mxu0 %v3355_v19  ;;  %1554 = vmatprep.mubr.f32.mxu1 %v3355_v19 }
 0x51c   :  { %2329 = vmatpush1.bf16.msra.mxu0 %v2686_v17  ;;  %2361 = vmatpush1.bf16.msra.mxu1 %v2722_v49 }
 0x51d   :  { %2331 = vmatprep.subr.bf16.mxu0 %v2690_v21  ;;  %2363 = vmatprep.subr.bf16.mxu1 %v2725_v52 }
 0x520   :  { %2333 = vmatpush1.bf16.msra.mxu0 %v2701_v31  ;;  %2365 = vmatpush1.bf16.msra.mxu1 %v2735_v61 }
 0x521   :  { %2335 = vmatprep.subr.bf16.mxu0 %v2706_v34  ;;  %2367 = vmatprep.subr.bf16.mxu1 %v2739_v1 }
 0x524   :  { %2337 = vmatpush1.bf16.msra.mxu0 %v2714_v43  ;;  %2369 = vmatpush1.bf16.msra.mxu1 %v2748_v12 }
 0x525   :  { %2339 = vmatprep.subr.bf16.mxu0 %v2718_v46  ;;  %2371 = vmatprep.subr.bf16.mxu1 %v2751_v16 }
 0x528   :  { %2341 = vmatpush1.bf16.msra.mxu0 %v2728_v55  ;;  %2373 = vmatpush1.bf16.msra.mxu1 %v2760_v28 }
 0x529   :  { %2343 = vmatprep.subr.bf16.mxu0 %v2732_v58  ;;  %2375 = vmatprep.subr.bf16.mxu1 %v2763_v29 }
 0x52c   :  { %2345 = vmatpush1.bf16.msra.mxu0 %v2742_v4  ;;  %2377 = vmatpush1.bf16.msra.mxu1 %v2770_v38 }
 0x52d   :  { %2347 = vmatprep.subr.bf16.mxu0 %v2745_v8  ;;  %2379 = vmatprep.subr.bf16.mxu1 %v2773_v39 }
 0x530   :  { %2349 = vmatpush1.bf16.msra.mxu0 %v2754_v20  ;;  %2381 = vmatpush1.bf16.msra.mxu1 %v2778_v47 }
 0x531   :  { %2351 = vmatprep.subr.bf16.mxu0 %v2757_v24  ;;  %2383 = vmatprep.subr.bf16.mxu1 %v3356_v10 }
 0x534   :  { %2353 = vmatpush1.bf16.msra.mxu0 %v3357_v54  ;;  %2385 = vmatpush1.bf16.msra.mxu1 %v3358_v62 }
 0x535   :  { %2387 = vmatprep.subr.bf16.mxu0 %v3359_v13  ;;  %2419 = vmatprep.subr.bf16.mxu1 %v3360_v63 }
 0x5ea   :  { %v1301_v36 = vpop.f32.mrb[10].mxu0  ;;  %v1372_v57 = vpop.f32.mrb[18].mxu1 }
 0x5eb   :  { %v1377_v56 = vadd.f32 %v1301_v36, %v2932_v59  ;;  %v1379_v22 = vadd.f32 %v1372_v57, %v2943_v41  ;;  %v1303_v27 = vpop.f32.mrb[11].mxu0  ;;  %v1374_v44 = vpop.f32.mrb[19].mxu1  ;;  %v2454_v36 = vpack.c.bf16 %v1770_v7, %v1769_v15  ;;  %v1771_v57 = vld [vmem:[%s3314_s4 + $0x20] sm:$0xff] }
 0x5ec   :  { %v1378_v50 = vadd.f32 %v1303_v27, %v2935_v60  ;;  %v1380_v0 = vadd.f32 %v1374_v44, %v3370_v48  ;;  %v1773_v27 = vld [vmem:[%s3314_s4 + $0x30] sm:$0xff]  ;;  %v1774_v44 = vld [vmem:[%s3314_s4 + $0x38] sm:$0xff]  ;;  %v1775_v48 = vld [vmem:[%s3314_s4 + $0x40] sm:$0xff] }
 0x5ed   :  { %v1381_v45 = vmul.f32 0.5, %v1377_v56  ;;  %v1772_v56 = vld [vmem:[%s3314_s4 + $0x28] sm:$0xff] }
 0x5ee   :  { %v1385_v25 = vmul.f32 0.5, %v1378_v50  ;;  %v1390_v13 = vmul.f32 0.5, %v1380_v0  ;;  %v2460_v50 = vpack.c.bf16 %v1774_v44, %v1773_v27  ;;  %v1776_v0 = vld [vmem:[%s3314_s4 + $0x48] sm:$0xff] }
 0x5ef   :  { %2533 = vtanh.f32 %v1381_v45  ;;  %v2463_v45 = vpack.c.bf16 %v1776_v0, %v1775_v48 }
 0x5f0   :  { %2535 = vtanh.f32 %v1385_v25  ;;  %v1777_v25 = vld [vmem:[%s3314_s4 + $0x50] sm:$0xff] }
 0x5f1   :  { %2537 = vtanh.f32 %v1379_v22  ;;  %v2457_v22 = vpack.c.bf16 %v1772_v56, %v1771_v57 }
 0x5f2   :  { %2539 = vtanh.f32 %v1390_v13  ;;  %v1778_v13 = vld [vmem:[%s3314_s4 + $0x58] sm:$0xff] }
 0x5f9   :  { %v2534_v35 = vpop.eup %2533 }
 0x5fa   :  { %v2536_v63 = vpop.eup %2535  ;;  %v1383_v30 = vmul.f32 0.5, %v2534_v35  ;;  %v2466_v35 = vpack.c.bf16 %v1778_v13, %v1777_v25 }
 0x5fb   :  { %v1387_v2 = vmul.f32 0.5, %v2536_v63  ;;  %v2538_v42 = vpop.eup %2537  ;;  %v1779_v63 = vld [vmem:[%s3314_s4 + $0x60] sm:$0xff] }
 0x5fc   :  { %v1384_v59 = vadd.f32 0.5, %v1383_v30  ;;  %v2540_v33 = vpop.eup %2539  ;;  %v1780_v30 = vld [vmem:[%s3314_s4 + $0x68] sm:$0xff] }
 0x5fd   :  { %v1388_v41 = vadd.f32 0.5, %v1387_v2  ;;  %v1392_v51 = vmul.f32 0.5, %v2540_v33  ;;  %v2469_v2 = vpack.c.bf16 %v1780_v30, %v1779_v63  ;;  %v3376_v33 = vld [vmem:[#allocation28_spill] sm:$0xff] }
 0x5fe   :  { %v1395_v5 = vmul.f32 %v2538_v42, %v1384_v59  ;;  %v1781_v59 = vld [vmem:[%s3314_s4 + $0x70] sm:$0xff] }
 0x5ff   :  { %v1394_v53 = vmul.f32 %v1388_v41, %v3156_v32  ;;  %v1393_v26 = vadd.f32 0.5, %v1392_v51  ;;  %v1767_v32 = vld [vmem:[%s3314_s4] sm:$0xff] }
 0x600   :  { %v2451_v18 = vpack.c.bf16 %v1768_v6, %v1767_v32 }
 0x601   :  { %v3198_v60 = vadd.f32 %v1395_v5, %v1394_v53  ;;  %v3375_v53 = vld [vmem:[#allocation27_spill] sm:$0xff] }
 0x603   :  { %2541 = vtanh.f32 %v3198_v60 }
 0x60d   :  { %v2542_v11 = vpop.eup %2541 }
 0x60e   :  { %v1398_v23 = vmul.f32 %v2542_v11, %v1393_v26 }
 0x610   :  { %1484 = vmatmul.mubr.f32.vlgmr.msra.gmra.mrb[12].mxu0 %v1398_v23  ;;  %1555 = vmatmul.mubr.f32.vlgmr.msra.gmra.mrb[20].mxu1 %v1398_v23  ;;  %v3377_v23 = vld [vmem:[#allocation29_spill] sm:$0xff] }
 0x611   :  { %2389 = vmatpush1.bf16.msra.mxu0 %v2675_v9  ;;  %2421 = vmatpush1.bf16.msra.mxu1 %v2709_v37 }
 0x612   :  { %2391 = vmatprep.subr.bf16.mxu0 %v2682_v14  ;;  %2423 = vmatprep.subr.bf16.mxu1 %v2711_v40 }
 0x613   :  { %1667 = vmatprep.mubr.f32.mxu0 %v3355_v19  ;;  %1738 = vmatprep.mubr.f32.mxu1 %v3355_v19 }
 0x615   :  { %2393 = vmatpush1.bf16.msra.mxu0 %v2686_v17  ;;  %2425 = vmatpush1.bf16.msra.mxu1 %v2722_v49  ;;  %v3371_v17 = vld [vmem:[#allocation23_spill] sm:$0xff]  ;;  %v3374_v49 = vld [vmem:[#allocation26_spill] sm:$0xff] }
 0x616   :  { %2395 = vmatprep.subr.bf16.mxu0 %v2690_v21  ;;  %2427 = vmatprep.subr.bf16.mxu1 %v2725_v52 }
 0x619   :  { %2397 = vmatpush1.bf16.msra.mxu0 %v2701_v31  ;;  %2429 = vmatpush1.bf16.msra.mxu1 %v2735_v61  ;;  %v3372_v31 = vld [vmem:[#allocation24_spill] sm:$0xff] }
 0x61a   :  { %2399 = vmatprep.subr.bf16.mxu0 %v2706_v34  ;;  %2431 = vmatprep.subr.bf16.mxu1 %v2739_v1 }
 0x61d   :  { %2401 = vmatpush1.bf16.msra.mxu0 %v2714_v43  ;;  %2433 = vmatpush1.bf16.msra.mxu1 %v2748_v12  ;;  %v3373_v43 = vld [vmem:[#allocation25_spill] sm:$0xff] }
 0x61e   :  { %2403 = vmatprep.subr.bf16.mxu0 %v2718_v46  ;;  %2435 = vmatprep.subr.bf16.mxu1 %v2751_v16 }
 0x621   :  { %2405 = vmatpush1.bf16.msra.mxu0 %v2728_v55  ;;  %2437 = vmatpush1.bf16.msra.mxu1 %v2760_v28 }
 0x622   :  { %2407 = vmatprep.subr.bf16.mxu0 %v2732_v58  ;;  %2439 = vmatprep.subr.bf16.mxu1 %v2763_v29 }
 0x625   :  { %2409 = vmatpush1.bf16.msra.mxu0 %v2742_v4  ;;  %2441 = vmatpush1.bf16.msra.mxu1 %v2770_v38 }
 0x626   :  { %2411 = vmatprep.subr.bf16.mxu0 %v2745_v8  ;;  %2443 = vmatprep.subr.bf16.mxu1 %v2773_v39 }
 0x629   :  { %2413 = vmatpush1.bf16.msra.mxu0 %v2754_v20  ;;  %2445 = vmatpush1.bf16.msra.mxu1 %v2778_v47 }
 0x62a   :  { %2415 = vmatprep.subr.bf16.mxu0 %v2757_v24  ;;  %2447 = vmatprep.subr.bf16.mxu1 %v3356_v10 }
 0x62d   :  { %2417 = vmatpush1.bf16.msra.mxu0 %v3357_v54  ;;  %2449 = vmatpush1.bf16.msra.mxu1 %v3358_v62 }
 0x62e   :  { %2450 = vmatprep.subr.bf16.mxu0 %v2615_v3 }
 0x6e3   :  { %v1485_v9 = vpop.f32.mrb[12].mxu0  ;;  %v1556_v14 = vpop.f32.mrb[20].mxu1 }
 0x6e4   :  { %v1561_v21 = vadd.f32 %v1485_v9, %v3371_v17  ;;  %v1563_v34 = vadd.f32 %v1556_v14, %v3372_v31  ;;  %v1487_v37 = vpop.f32.mrb[13].mxu0  ;;  %v1558_v40 = vpop.f32.mrb[21].mxu1  ;;  %v3378_v14 = vld [vmem:[#allocation30_spill] sm:$0xff] }
 0x6e5   :  { %v1562_v46 = vadd.f32 %v1487_v37, %v3373_v43  ;;  %v1564_v52 = vadd.f32 %v1558_v40, %v3374_v49 }
 0x6e6   :  { %v1565_v55 = vmul.f32 0.5, %v1561_v21 }
 0x6e7   :  { %v1569_v58 = vmul.f32 0.5, %v1562_v46  ;;  %v1574_v61 = vmul.f32 0.5, %v1564_v52 }
 0x6e8   :  { %2543 = vtanh.f32 %v1565_v55 }
 0x6e9   :  { %2545 = vtanh.f32 %v1569_v58 }
 0x6ea   :  { %2547 = vtanh.f32 %v1563_v34 }
 0x6eb   :  { %2549 = vtanh.f32 %v1574_v61 }
 0x6f2   :  { %v2544_v1 = vpop.eup %2543 }
 0x6f3   :  { %v2546_v4 = vpop.eup %2545  ;;  %v1567_v8 = vmul.f32 0.5, %v2544_v1 }
 0x6f4   :  { %v1571_v12 = vmul.f32 0.5, %v2546_v4  ;;  %v2548_v20 = vpop.eup %2547 }
 0x6f5   :  { %v1568_v16 = vadd.f32 0.5, %v1567_v8  ;;  %v2550_v39 = vpop.eup %2549 }
 0x6f6   :  { %v1572_v24 = vadd.f32 0.5, %v1571_v12  ;;  %v1576_v47 = vmul.f32 0.5, %v2550_v39 }
 0x6f7   :  { %v1579_v28 = vmul.f32 %v2548_v20, %v1568_v16 }
 0x6f8   :  { %v1578_v29 = vmul.f32 %v1572_v24, %v3198_v60  ;;  %v1577_v10 = vadd.f32 0.5, %v1576_v47  ;;  %v1885_v24 = vld [vmem:[%s3315_s5] ss:$0 sm:$0xff] }
 0x6fa   :  { %v3238_v38 = vadd.f32 %v1579_v28, %v1578_v29 }
 0x6fc   :  { %2551 = vtanh.f32 %v3238_v38 }
 0x706   :  { %v2552_v54 = vpop.eup %2551 }
 0x707   :  { %v1582_v62 = vmul.f32 %v2552_v54, %v1577_v10 }
 0x709   :  { %1668 = vmatmul.mubr.f32.vlgmr.msra.gmra.mrb[14].mxu0 %v1582_v62  ;;  %1739 = vmatmul.mubr.f32.vlgmr.msra.gmra.mrb[22].mxu1 %v1582_v62 }
 0x70a   :  { %2452 = vmatpush3.bf16.msra.mxu0 %v2451_v18  ;;  %1935 = vmatprep.mubr.msk.f32.mxu0 %vm2616_vm3, %v3355_v19  ;;  %v1782_v19 = vld [vmem:[%s3314_s4 + $0x78] sm:$0xff] }
 0x70b   :  { %2453 = vmatprep.subr.bf16.mxu0 %v2615_v3  ;;  %v2472_v42 = vpack.c.bf16 %v1782_v19, %v1781_v59 }
 0x70e   :  { %2455 = vmatpush3.bf16.msra.mxu0 %v2454_v36 }
 0x70f   :  { %2456 = vmatprep.subr.bf16.mxu0 %v2615_v3 }
 0x712   :  { %2458 = vmatpush3.bf16.msra.mxu0 %v2457_v22 }
 0x713   :  { %2459 = vmatprep.subr.bf16.mxu0 %v2615_v3 }
 0x716   :  { %2461 = vmatpush3.bf16.msra.mxu0 %v2460_v50 }
 0x717   :  { %2462 = vmatprep.subr.bf16.mxu0 %v2615_v3 }
 0x71a   :  { %2464 = vmatpush3.bf16.msra.mxu0 %v2463_v45 }
 0x71b   :  { %2465 = vmatprep.subr.bf16.mxu0 %v2615_v3 }
 0x71e   :  { %2467 = vmatpush3.bf16.msra.mxu0 %v2466_v35 }
 0x71f   :  { %2468 = vmatprep.subr.bf16.mxu0 %v2615_v3 }
 0x722   :  { %2470 = vmatpush3.bf16.msra.mxu0 %v2469_v2 }
 0x723   :  { %2471 = vmatprep.subr.bf16.mxu0 %v2615_v3 }
 0x726   :  { %2473 = vmatpush3.bf16.msra.mxu0 %v2472_v42 }
 0x7dc   :  { %v1669_v41 = vpop.f32.mrb[14].mxu0  ;;  %v1740_v5 = vpop.f32.mrb[22].mxu1 }
 0x7dd   :  { %v1745_v60 = vadd.f32 %v1669_v41, %v3375_v53  ;;  %v1747_v51 = vadd.f32 %v1740_v5, %v3376_v33  ;;  %v1671_v26 = vpop.f32.mrb[15].mxu0  ;;  %v1742_v11 = vpop.f32.mrb[23].mxu1 }
 0x7de   :  { %v1746_v9 = vadd.f32 %v1671_v26, %v3377_v23  ;;  %v1748_v17 = vadd.f32 %v1742_v11, %v3378_v14 }
 0x7df   :  { %v1749_v21 = vmul.f32 0.5, %v1745_v60 }
 0x7e0   :  { %v1753_v31 = vmul.f32 0.5, %v1746_v9  ;;  %v1758_v34 = vmul.f32 0.5, %v1748_v17 }
 0x7e1   :  { %2553 = vtanh.f32 %v1749_v21 }
 0x7e2   :  { %2555 = vtanh.f32 %v1753_v31 }
 0x7e3   :  { %2557 = vtanh.f32 %v1747_v51 }
 0x7e4   :  { %2559 = vtanh.f32 %v1758_v34 }
 0x7eb   :  { %v2554_v37 = vpop.eup %2553 }
 0x7ec   :  { %v2556_v40 = vpop.eup %2555  ;;  %v1751_v43 = vmul.f32 0.5, %v2554_v37 }
 0x7ed   :  { %v1755_v46 = vmul.f32 0.5, %v2556_v40  ;;  %v2558_v52 = vpop.eup %2557 }
 0x7ee   :  { %v1752_v49 = vadd.f32 0.5, %v1751_v43  ;;  %v2560_v4 = vpop.eup %2559 }
 0x7ef   :  { %v1756_v55 = vadd.f32 0.5, %v1755_v46  ;;  %v1760_v8 = vmul.f32 0.5, %v2560_v4 }
 0x7f0   :  { %v1763_v58 = vmul.f32 %v2558_v52, %v1752_v49 }
 0x7f1   :  { %v1762_v61 = vmul.f32 %v1756_v55, %v3238_v38  ;;  %v1761_v12 = vadd.f32 0.5, %v1760_v8 }
 0x7f3   :  { %v1764_v1 = vadd.f32 %v1763_v58, %v1762_v61 }
 0x7f5   :  { %2561 = vtanh.f32 %v1764_v1 }
 0x7ff   :  { %v2562_v16 = vpop.eup %2561 }
 0x800   :  { %v1766_v20 = vmul.f32 %v2562_v16, %v1761_v12 }
 0x802   :  { %1936 = vmatmul.mubr.f32.vlgmr.msra.gmra.mrb[16].mxu0 %v1766_v20 }
 0x8d5   :  { %v1856_v28 = vpop.f32.mrb[16].mxu0 }
 0x8d6   :  { %v1857_v29 = vadd.f32 %v1885_v24, %v1856_v28  ;;  %v1937_v39 = vpop.f32.mrb[17].mxu0 }
 0x8d8   :  { %1861 = vst.msk [vmem:[#allocation5] sm:$0x3] %vm1860_vm4, %v1857_v29 }
 0x8d9   :  { %2596 = shalt.err (!%p2593_p12)
}
 0x8da   :  { %s2597_s27 = scalar_lea.hbm %s3316_s6, 32 }
 0x8db   :  { %p2598_p13 = scmp.ne.s32.totalorder %s3316_s6, %s2597_s27  ;;  %p2601_p0 = scmp.lt.u32.totalorder %s2597_s27, %s3316_s6 }
 0x8dd   :  { %p2603_p1 = pnand %p2601_p0, %p2598_p13 }
 0x8df   :  { %2606 = shalt.err (!%p2603_p1)
}
 0x8e0   :  { %1871 = dma.vmem_to_hbm [thread:$0]  %s1869_s23, 32, %s3316_s6, [#allocation4]  }
 0x8e1   :  { %2609 = dma.done.wait [#allocation4], 32  }
 0x8e2   :  { %2610 = vsyncadd [#allocation4], 4294967264 }
 0x8e3   :  { %1875 = vsyncpa [#allocation3], 1 }
 0x8e4   :  { %1876 = vsyncpa [#allocation4], 1 }

</bundles_post_ra>
